<compile_context>
chip_gen: v5e
topology: v5e:2x2
jax: 0.10.0
libtpu: 0.0.40
codegen_flags: <defaults>
</compile_context>

<pallas_src>
import functools

import jax
import jax.numpy as jnp
import numpy as np
from jax.experimental import pallas as pl
from jax.experimental.pallas import tpu as pltpu

EPS = 1e-5  # nn.LayerNorm default


# ----------------------------------------------------------------------------- kernel


def _ln_last(x, g, b, inv_n):
    """LayerNorm over the last axis (biased variance), mean via sum * const."""
    mu = jnp.sum(x, axis=-1, keepdims=True) * inv_n
    xc = x - mu
    var = jnp.sum(xc * xc, axis=-1, keepdims=True) * inv_n
    return xc * jax.lax.rsqrt(var + EPS) * g + b


def _ln_chunks(x, avg, g, b):
    """Per-H-chunk LayerNorm of a (B, 3H) tensor in one vectorized pass.

    `avg` is a (3H, 3H) block-diagonal matrix with 1/H entries, so x @ avg puts
    each lane's chunk-mean in that lane (MXU does the segmented reduction)."""
    mu = jnp.dot(x, avg, preferred_element_type=jnp.float32)
    xc = x - mu
    var = jnp.dot(xc * xc, avg, preferred_element_type=jnp.float32)
    return xc * jax.lax.rsqrt(var + EPS) * g + b


def treelstm_kernel(x_ref, h_ref, c_ref,
                    wx_ref, wfh_ref, wiouh_ref, avg_ref,
                    f_g_ref, f_b_ref,
                    iou_g_ref, iou_b_ref,
                    post_a_ref, post_b_ref,
                    cell_g_ref, cell_b_ref,
                    out_ref):
    NB, Nmax, H = h_ref.shape
    inv_h = 1.0 / H

    x = x_ref[...]                                       # (NB, I)
    h3 = h_ref[...]                                      # (NB, Nmax, H) zero-padded children
    c3 = c_ref[...]                                      # (NB, Nmax, H)

    # Node-level x projection; lane order [f | i | o | u] (one lane-dense matmul).
    px = jnp.dot(x, wx_ref[...], preferred_element_type=jnp.float32)          # (NB, 4H)
    px_f = px[:, :H]
    px_iou = px[:, H:]

    # ---- forget gate: one per (node, child); only an H-wide per-child matmul --
    hf = jnp.dot(h3.reshape(NB * Nmax, H), wfh_ref[...],
                 preferred_element_type=jnp.float32).reshape(NB, Nmax, H)
    f_pre = hf + px_f[:, None, :]                                              # (NB, Nmax, H)
    f = jax.nn.sigmoid(_ln_last(f_pre, f_g_ref[...], f_b_ref[...], inv_h))
    fc_sum = jnp.sum(f * c3, axis=1)                                           # (NB, H)

    # ---- i / o / u gates: ChildSum => project the child-hidden sum once ------
    h_sum = jnp.sum(h3, axis=1)                                                # (NB, H)
    iou = px_iou + jnp.dot(h_sum, wiouh_ref[...],
                           preferred_element_type=jnp.float32)                 # (NB, 3H)
    iou_n = _ln_chunks(iou, avg_ref[...], iou_g_ref[...], iou_b_ref[...])
    # sigmoid(y) = 0.5*tanh(y/2)+0.5; the /2 is pre-folded into iou gamma/beta,
    # the *0.5+0.5 lives in the resident post-affine -> a single EUP tanh pass.
    t = jnp.tanh(iou_n)
    act = t * post_a_ref[...] + post_b_ref[...]
    i_g = act[:, 0:H]
    o_g = act[:, H:2 * H]
    u_g = act[:, 2 * H:3 * H]          # dropout == identity (eval)

    # ---- new cell / hidden ---------------------------------------------------
    cell_pre = i_g * u_g + fc_sum
    new_c = _ln_last(cell_pre, cell_g_ref[...], cell_b_ref[...], inv_h)
    new_h = o_g * jnp.tanh(new_c)

    out_ref[...] = jnp.concatenate([new_h, new_c], axis=-1)                    # (NB, 2H)


# ----------------------------------------------------------------------------- wrapper


@functools.partial(jax.jit, static_argnames=("block_nodes",))
def treelstm_childsum_forward(x, h, c, params, *, block_nodes=16):
    """Batched ChildSum TreeLSTM cell.

    x: (T, I) node inputs; h, c: (T, Nmax, H) child states, zero-padded in the
    child axis for nodes with fewer than Nmax children (a single all-zero child
    reproduces the module's default init_hidden/init_cell state).
    Returns (new_h, new_c), each (T, H).
    """
    T, I = x.shape
    _, Nmax, H = h.shape

    # Kernel-layout parameters (fused / flattened); constant across grid steps.
    wx = jnp.concatenate([params["w_fi"], params["w_iou_x"]], axis=1)          # (I, 4H)
    wfh = params["w_fh"]                                                        # (H, H)
    wiouh = params["w_iou_h"]                                                   # (H, 3H)
    avg = jnp.kron(jnp.eye(3, dtype=jnp.float32),
                   jnp.full((H, H), 1.0 / H, jnp.float32))                      # (3H, 3H)
    f_g = params["f_g"].reshape(1, H)
    f_b = params["f_b"].reshape(1, H)
    # Fold the sigmoid argument halving (i, o lanes) into the LN affine; the
    # post-affine (0.5*t+0.5 for i,o; identity for u) is a resident constant.
    pre = jnp.concatenate([jnp.full((2 * H,), 0.5, jnp.float32),
                           jnp.ones((H,), jnp.float32)]).reshape(1, 3 * H)
    iou_g = params["iou_g"].reshape(1, 3 * H) * pre
    iou_b = params["iou_b"].reshape(1, 3 * H) * pre
    post_a = pre
    post_b = jnp.concatenate([jnp.full((2 * H,), 0.5, jnp.float32),
                              jnp.zeros((H,), jnp.float32)]).reshape(1, 3 * H)
    cell_g = params["cell_g"].reshape(1, H)
    cell_b = params["cell_b"].reshape(1, H)

    NB = block_nodes
    Tp = ((T + NB - 1) // NB) * NB
    if Tp != T:
        pad = Tp - T
        x = jnp.pad(x, ((0, pad), (0, 0)))
        h = jnp.pad(h, ((0, pad), (0, 0), (0, 0)))
        c = jnp.pad(c, ((0, pad), (0, 0), (0, 0)))

    const2 = lambda n: (0, 0)

    out = pl.pallas_call(
        treelstm_kernel,
        out_shape=jax.ShapeDtypeStruct((Tp, 2 * H), jnp.float32),
        grid=(Tp // NB,),
        in_specs=[
            pl.BlockSpec((NB, I), lambda n: (n, 0)),            # x        (advances)
            pl.BlockSpec((NB, Nmax, H), lambda n: (n, 0, 0)),   # child h  (advances)
            pl.BlockSpec((NB, Nmax, H), lambda n: (n, 0, 0)),   # child c  (advances)
            pl.BlockSpec((I, 4 * H), const2),                   # fused x-weights (resident)
            pl.BlockSpec((H, H), const2),                       # forget h-weights (resident)
            pl.BlockSpec((H, 3 * H), const2),                   # iou h-weights   (resident)
            pl.BlockSpec((3 * H, 3 * H), const2),               # chunk-avg matrix (resident)
            pl.BlockSpec((1, H), const2),                       # f_ln gamma
            pl.BlockSpec((1, H), const2),                       # f_ln beta
            pl.BlockSpec((1, 3 * H), const2),                   # iou_ln gammas (pre-scaled)
            pl.BlockSpec((1, 3 * H), const2),                   # iou_ln betas  (pre-scaled)
            pl.BlockSpec((1, 3 * H), const2),                   # post-affine scale
            pl.BlockSpec((1, 3 * H), const2),                   # post-affine bias
            pl.BlockSpec((1, H), const2),                       # cell_ln gamma
            pl.BlockSpec((1, H), const2),                       # cell_ln beta
        ],
        out_specs=pl.BlockSpec((NB, 2 * H), lambda n: (n, 0)),
        compiler_params=pltpu.CompilerParams(
            dimension_semantics=("parallel",)),
    )(x, h, c, wx, wfh, wiouh, avg, f_g, f_b, iou_g, iou_b,
      post_a, post_b, cell_g, cell_b)

    return out[:T, :H], out[:T, H:]


# ----------------------------------------------------------------------------- reference


def _ln_ref(x, g, b):
    mu = jnp.mean(x, axis=-1, keepdims=True)
    xc = x - mu
    var = jnp.mean(xc * xc, axis=-1, keepdims=True)
    return xc * jax.lax.rsqrt(var + EPS) * g + b


def treelstm_node_reference(x_t, h_t, c_t, p):
    """Pure-JAX mirror of the PyTorch forward for a single node (real children only)."""
    H = h_t.shape[-1]
    f_lin = x_t[None, :] @ p["w_fi"] + h_t @ p["w_fh"]                 # (n, H)
    hsum = h_t.sum(0, keepdims=True)                                   # (1, H)
    iou = x_t[None, :] @ p["w_iou_x"] + hsum @ p["w_iou_h"]            # (1, 3H)
    f_lin = _ln_ref(f_lin, p["f_g"], p["f_b"])
    i_lin = _ln_ref(iou[:, 0:H], p["iou_g"][0], p["iou_b"][0])
    o_lin = _ln_ref(iou[:, H:2 * H], p["iou_g"][1], p["iou_b"][1])
    u_lin = _ln_ref(iou[:, 2 * H:], p["iou_g"][2], p["iou_b"][2])
    f = jax.nn.sigmoid(f_lin)
    i = jax.nn.sigmoid(i_lin)
    o = jax.nn.sigmoid(o_lin)
    u = jnp.tanh(u_lin)                                                # dropout == identity
    new_c = _ln_ref(i * u + (f * c_t).sum(0, keepdims=True), p["cell_g"], p["cell_b"])
    new_h = o * jnp.tanh(new_c)
    return new_h[0], new_c[0]


# ----------------------------------------------------------------------------- params


def make_params(key, input_size, hidden_size):
    """Synthetic parameters matching the nn.Module (layer_norm_enabled=True => no linear
    biases). Linear weights are pre-transposed to (in, out)."""
    I, H = input_size, hidden_size
    ks = jax.random.split(key, 9)
    s = 0.1
    w_iou = s * jax.random.normal(ks[0], (3 * H, I + H), jnp.float32)  # torch (out, in)
    return {
        "w_fi": jnp.transpose(s * jax.random.normal(ks[1], (H, I), jnp.float32)),  # (I, H)
        "w_fh": jnp.transpose(s * jax.random.normal(ks[2], (H, H), jnp.float32)),  # (H, H)
        "w_iou_x": jnp.transpose(w_iou[:, :I]),                                    # (I, 3H)
        "w_iou_h": jnp.transpose(w_iou[:, I:]),                                    # (H, 3H)
        "f_g": 1.0 + 0.05 * jax.random.normal(ks[3], (H,), jnp.float32),
        "f_b": 0.05 * jax.random.normal(ks[4], (H,), jnp.float32),
        "iou_g": 1.0 + 0.05 * jax.random.normal(ks[5], (3, H), jnp.float32),
        "iou_b": 0.05 * jax.random.normal(ks[6], (3, H), jnp.float32),
        "cell_g": 1.0 + 0.05 * jax.random.normal(ks[7], (H,), jnp.float32),
        "cell_b": 0.05 * jax.random.normal(ks[8], (H,), jnp.float32),
    }


# ----------------------------------------------------------------------------- main


if __name__ == "__main__":
    INPUT_SIZE = 64
    HIDDEN_SIZE = 64   # -> 2H = 128 lanes: fully lane-dense output slab
    NMAX = 8           # fixed child-padding (one sublane tile)
    T = 40             # number of tree nodes processed in one batched call
    NB = 16            # nodes per grid step

    key = jax.random.PRNGKey(0)
    kp, kx, kh, kc, kn = jax.random.split(key, 5)

    params = make_params(kp, INPUT_SIZE, HIDDEN_SIZE)
    x = jax.random.normal(kx, (T, INPUT_SIZE), jnp.float32)
    n_children = np.asarray(jax.random.randint(kn, (T,), 1, NMAX + 1))

    h_full = jax.random.normal(kh, (T, NMAX, HIDDEN_SIZE), jnp.float32)
    c_full = jax.random.normal(kc, (T, NMAX, HIDDEN_SIZE), jnp.float32)
    child_mask = (np.arange(NMAX)[None, :] < n_children[:, None]).astype(np.float32)
    mask = jnp.asarray(child_mask)[:, :, None]
    h_pad = h_full * mask      # padded child slots are exactly zero
    c_pad = c_full * mask

    new_h, new_c = treelstm_childsum_forward(x, h_pad, c_pad, params, block_nodes=NB)
    jax.block_until_ready((new_h, new_c))

    # Validate every node against the per-node reference using only its real children.
    for t in range(T):
        n = int(n_children[t])
        rh, rc = treelstm_node_reference(x[t], h_pad[t, :n], c_pad[t, :n], params)
        np.testing.assert_allclose(np.asarray(new_h[t]), np.asarray(rh), atol=5e-2, rtol=5e-2)
        np.testing.assert_allclose(np.asarray(new_c[t]), np.asarray(rc), atol=5e-2, rtol=5e-2)

    assert new_h.shape == (T, HIDDEN_SIZE) and new_c.shape == (T, HIDDEN_SIZE)
    print("KERNEL_OK")
</pallas_src>

<mosaic_0001>
module attributes {stable_mosaic.version = 11 : i64} {
  func.func @treelstm_kernel(%arg0: i32, %arg1: memref<16x64xf32, #tpu.memory_space<vmem>>, %arg2: memref<16x8x64xf32, #tpu.memory_space<vmem>>, %arg3: memref<16x8x64xf32, #tpu.memory_space<vmem>>, %arg4: memref<64x256xf32, #tpu.memory_space<vmem>>, %arg5: memref<64x64xf32, #tpu.memory_space<vmem>>, %arg6: memref<64x192xf32, #tpu.memory_space<vmem>>, %arg7: memref<192x192xf32, #tpu.memory_space<vmem>>, %arg8: memref<1x64xf32, #tpu.memory_space<vmem>>, %arg9: memref<1x64xf32, #tpu.memory_space<vmem>>, %arg10: memref<1x192xf32, #tpu.memory_space<vmem>>, %arg11: memref<1x192xf32, #tpu.memory_space<vmem>>, %arg12: memref<1x192xf32, #tpu.memory_space<vmem>>, %arg13: memref<1x192xf32, #tpu.memory_space<vmem>>, %arg14: memref<1x64xf32, #tpu.memory_space<vmem>>, %arg15: memref<1x64xf32, #tpu.memory_space<vmem>>, %arg16: memref<16x128xf32, #tpu.memory_space<vmem>>) attributes {dimension_semantics = [#tpu.dimension_semantics<parallel>], iteration_bounds = array<i64: 3>, scalar_prefetch = 0 : i64, scratch_operands = 0 : i64, tpu.core_type = #tpu.core_type<tc>, window_params = [{transform_indices = @transform_0, window_bounds = array<i64: 16, 64>}, {transform_indices = @transform_1, window_bounds = array<i64: 16, 8, 64>}, {transform_indices = @transform_2, window_bounds = array<i64: 16, 8, 64>}, {pipeline_mode = #tpu.pipeline_mode<synchronous>, transform_indices = @transform_3, window_bounds = array<i64: 64, 256>}, {pipeline_mode = #tpu.pipeline_mode<synchronous>, transform_indices = @transform_4, window_bounds = array<i64: 64, 64>}, {pipeline_mode = #tpu.pipeline_mode<synchronous>, transform_indices = @transform_5, window_bounds = array<i64: 64, 192>}, {pipeline_mode = #tpu.pipeline_mode<synchronous>, transform_indices = @transform_6, window_bounds = array<i64: 192, 192>}, {pipeline_mode = #tpu.pipeline_mode<synchronous>, transform_indices = @transform_7, window_bounds = array<i64: 1, 64>}, {pipeline_mode = #tpu.pipeline_mode<synchronous>, transform_indices = @transform_8, window_bounds = array<i64: 1, 64>}, {pipeline_mode = #tpu.pipeline_mode<synchronous>, transform_indices = @transform_9, window_bounds = array<i64: 1, 192>}, {pipeline_mode = #tpu.pipeline_mode<synchronous>, transform_indices = @transform_10, window_bounds = array<i64: 1, 192>}, {pipeline_mode = #tpu.pipeline_mode<synchronous>, transform_indices = @transform_11, window_bounds = array<i64: 1, 192>}, {pipeline_mode = #tpu.pipeline_mode<synchronous>, transform_indices = @transform_12, window_bounds = array<i64: 1, 192>}, {pipeline_mode = #tpu.pipeline_mode<synchronous>, transform_indices = @transform_13, window_bounds = array<i64: 1, 64>}, {pipeline_mode = #tpu.pipeline_mode<synchronous>, transform_indices = @transform_14, window_bounds = array<i64: 1, 64>}, {transform_indices = @transform_15, window_bounds = array<i64: 16, 128>}]} {
    %c0 = arith.constant 0 : index
    %c0_0 = arith.constant 0 : index
    %0 = vector.load %arg1[%c0, %c0_0] : memref<16x64xf32, #tpu.memory_space<vmem>>, vector<16x64xf32>
    %c0_1 = arith.constant 0 : index
    %c0_2 = arith.constant 0 : index
    %c0_3 = arith.constant 0 : index
    %1 = vector.load %arg2[%c0_1, %c0_2, %c0_3] : memref<16x8x64xf32, #tpu.memory_space<vmem>>, vector<16x8x64xf32>
    %c0_4 = arith.constant 0 : index
    %c0_5 = arith.constant 0 : index
    %c0_6 = arith.constant 0 : index
    %2 = vector.load %arg3[%c0_4, %c0_5, %c0_6] : memref<16x8x64xf32, #tpu.memory_space<vmem>>, vector<16x8x64xf32>
    %c0_7 = arith.constant 0 : index
    %c0_8 = arith.constant 0 : index
    %3 = vector.load %arg4[%c0_7, %c0_8] : memref<64x256xf32, #tpu.memory_space<vmem>>, vector<64x256xf32>
    %cst = arith.constant dense<0.000000e+00> : vector<16x256xf32>
    %4 = tpu.matmul %0, %3, %cst {dimension_numbers = #tpu.dot_dimension_numbers<[1], [0], [0], [1], [0, 0, 1, 1], [], []>} : vector<16x64xf32>, vector<64x256xf32>, vector<16x256xf32> -> vector<16x256xf32>
    %5 = vector.extract_strided_slice %4 {offsets = [0, 0], sizes = [16, 64], strides = [1, 1]} : vector<16x256xf32> to vector<16x64xf32>
    %6 = vector.extract_strided_slice %4 {offsets = [0, 64], sizes = [16, 192], strides = [1, 1]} : vector<16x256xf32> to vector<16x192xf32>
    %7 = vector.shape_cast %1 : vector<16x8x64xf32> to vector<128x64xf32>
    %c0_9 = arith.constant 0 : index
    %c0_10 = arith.constant 0 : index
    %8 = vector.load %arg5[%c0_9, %c0_10] : memref<64x64xf32, #tpu.memory_space<vmem>>, vector<64x64xf32>
    %cst_11 = arith.constant dense<0.000000e+00> : vector<128x64xf32>
    %9 = tpu.matmul %7, %8, %cst_11 {dimension_numbers = #tpu.dot_dimension_numbers<[1], [0], [0], [1], [0, 0, 1, 1], [], []>} : vector<128x64xf32>, vector<64x64xf32>, vector<128x64xf32> -> vector<128x64xf32>
    %10 = vector.shape_cast %9 : vector<128x64xf32> to vector<16x8x64xf32>
    %11 = vector.shape_cast %5 : vector<16x64xf32> to vector<16x1x64xf32>
    %12 = vector.broadcast %11 : vector<16x1x64xf32> to vector<16x8x64xf32>
    %13 = arith.addf %10, %12 : vector<16x8x64xf32>
    %c0_12 = arith.constant 0 : index
    %c0_13 = arith.constant 0 : index
    %14 = vector.load %arg8[%c0_12, %c0_13] : memref<1x64xf32, #tpu.memory_space<vmem>>, vector<1x64xf32>
    %c0_14 = arith.constant 0 : index
    %c0_15 = arith.constant 0 : index
    %15 = vector.load %arg9[%c0_14, %c0_15] : memref<1x64xf32, #tpu.memory_space<vmem>>, vector<1x64xf32>
    %cst_16 = arith.constant dense<0.000000e+00> : vector<16x8xf32>
    %16 = vector.multi_reduction <add>, %13, %cst_16 [2] : vector<16x8x64xf32> to vector<16x8xf32>
    %17 = vector.shape_cast %16 : vector<16x8xf32> to vector<16x8x1xf32>
    %cst_17 = arith.constant 1.562500e-02 : f32
    %18 = vector.broadcast %cst_17 : f32 to vector<16x8x1xf32>
    %19 = arith.mulf %17, %18 : vector<16x8x1xf32>
    %20 = vector.broadcast %19 : vector<16x8x1xf32> to vector<16x8x64xf32>
    %21 = arith.subf %13, %20 : vector<16x8x64xf32>
    %22 = arith.mulf %21, %21 : vector<16x8x64xf32>
    %cst_18 = arith.constant dense<0.000000e+00> : vector<16x8xf32>
    %23 = vector.multi_reduction <add>, %22, %cst_18 [2] : vector<16x8x64xf32> to vector<16x8xf32>
    %24 = vector.shape_cast %23 : vector<16x8xf32> to vector<16x8x1xf32>
    %cst_19 = arith.constant 1.562500e-02 : f32
    %25 = vector.broadcast %cst_19 : f32 to vector<16x8x1xf32>
    %26 = arith.mulf %24, %25 : vector<16x8x1xf32>
    %cst_20 = arith.constant 9.99999974E-6 : f32
    %27 = vector.broadcast %cst_20 : f32 to vector<16x8x1xf32>
    %28 = arith.addf %26, %27 : vector<16x8x1xf32>
    %29 = math.rsqrt %28 : vector<16x8x1xf32>
    %30 = vector.broadcast %29 : vector<16x8x1xf32> to vector<16x8x64xf32>
    %31 = arith.mulf %21, %30 : vector<16x8x64xf32>
    %32 = vector.shape_cast %14 : vector<1x64xf32> to vector<1x1x64xf32>
    %33 = vector.broadcast %32 : vector<1x1x64xf32> to vector<16x8x64xf32>
    %34 = arith.mulf %31, %33 : vector<16x8x64xf32>
    %35 = vector.shape_cast %15 : vector<1x64xf32> to vector<1x1x64xf32>
    %36 = vector.broadcast %35 : vector<1x1x64xf32> to vector<16x8x64xf32>
    %37 = arith.addf %34, %36 : vector<16x8x64xf32>
    %38 = arith.negf %37 : vector<16x8x64xf32>
    %39 = math.exp %38 : vector<16x8x64xf32>
    %cst_21 = arith.constant 1.000000e+00 : f32
    %40 = vector.broadcast %cst_21 : f32 to vector<16x8x64xf32>
    %41 = arith.addf %40, %39 : vector<16x8x64xf32>
    %42 = arith.divf %40, %41 : vector<16x8x64xf32>
    %43 = arith.mulf %42, %2 : vector<16x8x64xf32>
    %cst_22 = arith.constant dense<0.000000e+00> : vector<16x64xf32>
    %44 = vector.multi_reduction <add>, %43, %cst_22 [1] : vector<16x8x64xf32> to vector<16x64xf32>
    %cst_23 = arith.constant dense<0.000000e+00> : vector<16x64xf32>
    %45 = vector.multi_reduction <add>, %1, %cst_23 [1] : vector<16x8x64xf32> to vector<16x64xf32>
    %c0_24 = arith.constant 0 : index
    %c0_25 = arith.constant 0 : index
    %46 = vector.load %arg6[%c0_24, %c0_25] : memref<64x192xf32, #tpu.memory_space<vmem>>, vector<64x192xf32>
    %cst_26 = arith.constant dense<0.000000e+00> : vector<16x192xf32>
    %47 = tpu.matmul %45, %46, %cst_26 {dimension_numbers = #tpu.dot_dimension_numbers<[1], [0], [0], [1], [0, 0, 1, 1], [], []>} : vector<16x64xf32>, vector<64x192xf32>, vector<16x192xf32> -> vector<16x192xf32>
    %48 = arith.addf %6, %47 : vector<16x192xf32>
    %c0_27 = arith.constant 0 : index
    %c0_28 = arith.constant 0 : index
    %49 = vector.load %arg7[%c0_27, %c0_28] : memref<192x192xf32, #tpu.memory_space<vmem>>, vector<192x192xf32>
    %c0_29 = arith.constant 0 : index
    %c0_30 = arith.constant 0 : index
    %50 = vector.load %arg10[%c0_29, %c0_30] : memref<1x192xf32, #tpu.memory_space<vmem>>, vector<1x192xf32>
    %c0_31 = arith.constant 0 : index
    %c0_32 = arith.constant 0 : index
    %51 = vector.load %arg11[%c0_31, %c0_32] : memref<1x192xf32, #tpu.memory_space<vmem>>, vector<1x192xf32>
    %cst_33 = arith.constant dense<0.000000e+00> : vector<16x192xf32>
    %52 = tpu.matmul %48, %49, %cst_33 {dimension_numbers = #tpu.dot_dimension_numbers<[1], [0], [0], [1], [0, 0, 1, 1], [], []>} : vector<16x192xf32>, vector<192x192xf32>, vector<16x192xf32> -> vector<16x192xf32>
    %53 = arith.subf %48, %52 : vector<16x192xf32>
    %54 = arith.mulf %53, %53 : vector<16x192xf32>
    %cst_34 = arith.constant dense<0.000000e+00> : vector<16x192xf32>
    %55 = tpu.matmul %54, %49, %cst_34 {dimension_numbers = #tpu.dot_dimension_numbers<[1], [0], [0], [1], [0, 0, 1, 1], [], []>} : vector<16x192xf32>, vector<192x192xf32>, vector<16x192xf32> -> vector<16x192xf32>
    %cst_35 = arith.constant 9.99999974E-6 : f32
    %56 = vector.broadcast %cst_35 : f32 to vector<16x192xf32>
    %57 = arith.addf %55, %56 : vector<16x192xf32>
    %58 = math.rsqrt %57 : vector<16x192xf32>
    %59 = arith.mulf %53, %58 : vector<16x192xf32>
    %60 = vector.broadcast %50 : vector<1x192xf32> to vector<16x192xf32>
    %61 = arith.mulf %59, %60 : vector<16x192xf32>
    %62 = vector.broadcast %51 : vector<1x192xf32> to vector<16x192xf32>
    %63 = arith.addf %61, %62 : vector<16x192xf32>
    %64 = math.tanh %63 : vector<16x192xf32>
    %c0_36 = arith.constant 0 : index
    %c0_37 = arith.constant 0 : index
    %65 = vector.load %arg12[%c0_36, %c0_37] : memref<1x192xf32, #tpu.memory_space<vmem>>, vector<1x192xf32>
    %66 = vector.broadcast %65 : vector<1x192xf32> to vector<16x192xf32>
    %67 = arith.mulf %64, %66 : vector<16x192xf32>
    %c0_38 = arith.constant 0 : index
    %c0_39 = arith.constant 0 : index
    %68 = vector.load %arg13[%c0_38, %c0_39] : memref<1x192xf32, #tpu.memory_space<vmem>>, vector<1x192xf32>
    %69 = vector.broadcast %68 : vector<1x192xf32> to vector<16x192xf32>
    %70 = arith.addf %67, %69 : vector<16x192xf32>
    %71 = vector.extract_strided_slice %70 {offsets = [0, 0], sizes = [16, 64], strides = [1, 1]} : vector<16x192xf32> to vector<16x64xf32>
    %72 = vector.extract_strided_slice %70 {offsets = [0, 64], sizes = [16, 64], strides = [1, 1]} : vector<16x192xf32> to vector<16x64xf32>
    %73 = vector.extract_strided_slice %70 {offsets = [0, 128], sizes = [16, 64], strides = [1, 1]} : vector<16x192xf32> to vector<16x64xf32>
    %74 = arith.mulf %71, %73 : vector<16x64xf32>
    %75 = arith.addf %74, %44 : vector<16x64xf32>
    %c0_40 = arith.constant 0 : index
    %c0_41 = arith.constant 0 : index
    %76 = vector.load %arg14[%c0_40, %c0_41] : memref<1x64xf32, #tpu.memory_space<vmem>>, vector<1x64xf32>
    %c0_42 = arith.constant 0 : index
    %c0_43 = arith.constant 0 : index
    %77 = vector.load %arg15[%c0_42, %c0_43] : memref<1x64xf32, #tpu.memory_space<vmem>>, vector<1x64xf32>
    %cst_44 = arith.constant dense<0.000000e+00> : vector<16xf32>
    %78 = vector.multi_reduction <add>, %75, %cst_44 [1] : vector<16x64xf32> to vector<16xf32>
    %79 = vector.shape_cast %78 : vector<16xf32> to vector<16x1xf32>
    %cst_45 = arith.constant 1.562500e-02 : f32
    %80 = vector.broadcast %cst_45 : f32 to vector<16x1xf32>
    %81 = arith.mulf %79, %80 : vector<16x1xf32>
    %82 = vector.broadcast %81 : vector<16x1xf32> to vector<16x64xf32>
    %83 = arith.subf %75, %82 : vector<16x64xf32>
    %84 = arith.mulf %83, %83 : vector<16x64xf32>
    %cst_46 = arith.constant dense<0.000000e+00> : vector<16xf32>
    %85 = vector.multi_reduction <add>, %84, %cst_46 [1] : vector<16x64xf32> to vector<16xf32>
    %86 = vector.shape_cast %85 : vector<16xf32> to vector<16x1xf32>
    %cst_47 = arith.constant 1.562500e-02 : f32
    %87 = vector.broadcast %cst_47 : f32 to vector<16x1xf32>
    %88 = arith.mulf %86, %87 : vector<16x1xf32>
    %cst_48 = arith.constant 9.99999974E-6 : f32
    %89 = vector.broadcast %cst_48 : f32 to vector<16x1xf32>
    %90 = arith.addf %88, %89 : vector<16x1xf32>
    %91 = math.rsqrt %90 : vector<16x1xf32>
    %92 = vector.broadcast %91 : vector<16x1xf32> to vector<16x64xf32>
    %93 = arith.mulf %83, %92 : vector<16x64xf32>
    %94 = vector.broadcast %76 : vector<1x64xf32> to vector<16x64xf32>
    %95 = arith.mulf %93, %94 : vector<16x64xf32>
    %96 = vector.broadcast %77 : vector<1x64xf32> to vector<16x64xf32>
    %97 = arith.addf %95, %96 : vector<16x64xf32>
    %98 = math.tanh %97 : vector<16x64xf32>
    %99 = arith.mulf %72, %98 : vector<16x64xf32>
    %100 = tpu.concatenate %99, %97 in 1 : vector<16x64xf32>, vector<16x64xf32> -> vector<16x128xf32>
    %c0_49 = arith.constant 0 : index
    %c0_50 = arith.constant 0 : index
    %101 = vector.load %arg16[%c0_49, %c0_50] : memref<16x128xf32, #tpu.memory_space<vmem>>, vector<16x128xf32>
    tpu.vector_store %arg16[%c0_49, %c0_50], %100 {strides = array<i32>} : memref<16x128xf32, #tpu.memory_space<vmem>>, vector<16x128xf32>,
    return
  }
  func.func @transform_0(%arg0: i32) -> (i32, i32) {
    %c0_i32 = arith.constant 0 : i32
    %c0_i32_0 = arith.constant 0 : i32
    return %arg0, %c0_i32 : i32, i32
  }
  func.func @transform_1(%arg0: i32) -> (i32, i32, i32) {
    %c0_i32 = arith.constant 0 : i32
    %c0_i32_0 = arith.constant 0 : i32
    %c0_i32_1 = arith.constant 0 : i32
    return %arg0, %c0_i32, %c0_i32_0 : i32, i32, i32
  }
  func.func @transform_2(%arg0: i32) -> (i32, i32, i32) {
    %c0_i32 = arith.constant 0 : i32
    %c0_i32_0 = arith.constant 0 : i32
    %c0_i32_1 = arith.constant 0 : i32
    return %arg0, %c0_i32, %c0_i32_0 : i32, i32, i32
  }
  func.func @transform_3(%arg0: i32) -> (i32, i32) {
    %c0_i32 = arith.constant 0 : i32
    %c0_i32_0 = arith.constant 0 : i32
    %c0_i32_1 = arith.constant 0 : i32
    return %c0_i32, %c0_i32_0 : i32, i32
  }
  func.func @transform_4(%arg0: i32) -> (i32, i32) {
    %c0_i32 = arith.constant 0 : i32
    %c0_i32_0 = arith.constant 0 : i32
    %c0_i32_1 = arith.constant 0 : i32
    return %c0_i32, %c0_i32_0 : i32, i32
  }
  func.func @transform_5(%arg0: i32) -> (i32, i32) {
    %c0_i32 = arith.constant 0 : i32
    %c0_i32_0 = arith.constant 0 : i32
    %c0_i32_1 = arith.constant 0 : i32
    return %c0_i32, %c0_i32_0 : i32, i32
  }
  func.func @transform_6(%arg0: i32) -> (i32, i32) {
    %c0_i32 = arith.constant 0 : i32
    %c0_i32_0 = arith.constant 0 : i32
    %c0_i32_1 = arith.constant 0 : i32
    return %c0_i32, %c0_i32_0 : i32, i32
  }
  func.func @transform_7(%arg0: i32) -> (i32, i32) {
    %c0_i32 = arith.constant 0 : i32
    %c0_i32_0 = arith.constant 0 : i32
    %c0_i32_1 = arith.constant 0 : i32
    return %c0_i32, %c0_i32_0 : i32, i32
  }
  func.func @transform_8(%arg0: i32) -> (i32, i32) {
    %c0_i32 = arith.constant 0 : i32
    %c0_i32_0 = arith.constant 0 : i32
    %c0_i32_1 = arith.constant 0 : i32
    return %c0_i32, %c0_i32_0 : i32, i32
  }
  func.func @transform_9(%arg0: i32) -> (i32, i32) {
    %c0_i32 = arith.constant 0 : i32
    %c0_i32_0 = arith.constant 0 : i32
    %c0_i32_1 = arith.constant 0 : i32
    return %c0_i32, %c0_i32_0 : i32, i32
  }
  func.func @transform_10(%arg0: i32) -> (i32, i32) {
    %c0_i32 = arith.constant 0 : i32
    %c0_i32_0 = arith.constant 0 : i32
    %c0_i32_1 = arith.constant 0 : i32
    return %c0_i32, %c0_i32_0 : i32, i32
  }
  func.func @transform_11(%arg0: i32) -> (i32, i32) {
    %c0_i32 = arith.constant 0 : i32
    %c0_i32_0 = arith.constant 0 : i32
    %c0_i32_1 = arith.constant 0 : i32
    return %c0_i32, %c0_i32_0 : i32, i32
  }
  func.func @transform_12(%arg0: i32) -> (i32, i32) {
    %c0_i32 = arith.constant 0 : i32
    %c0_i32_0 = arith.constant 0 : i32
    %c0_i32_1 = arith.constant 0 : i32
    return %c0_i32, %c0_i32_0 : i32, i32
  }
  func.func @transform_13(%arg0: i32) -> (i32, i32) {
    %c0_i32 = arith.constant 0 : i32
    %c0_i32_0 = arith.constant 0 : i32
    %c0_i32_1 = arith.constant 0 : i32
    return %c0_i32, %c0_i32_0 : i32, i32
  }
  func.func @transform_14(%arg0: i32) -> (i32, i32) {
    %c0_i32 = arith.constant 0 : i32
    %c0_i32_0 = arith.constant 0 : i32
    %c0_i32_1 = arith.constant 0 : i32
    return %c0_i32, %c0_i32_0 : i32, i32
  }
  func.func @transform_15(%arg0: i32) -> (i32, i32) {
    %c0_i32 = arith.constant 0 : i32
    %c0_i32_0 = arith.constant 0 : i32
    return %arg0, %c0_i32 : i32, i32
  }
}

</mosaic_0001>

<bundles_post_ra>
// kernel: treelstm_childsum_forward.1
= control target key start
LH: loop header
LB: loop body
LE: loop exit
PB: predicated region body
PF: predicated region fallthrough
CT: control target
= control target key end

     0   :  { %s2825_s18 = smov 0   ;;  %s4513_s0 = inlined_call_operand.vmem [shape: f32[48,64], index: 0, kind: input, shape index: {}]   ;;  %s4514_s1 = inlined_call_operand.vmem [shape: f32[48,8,64], index: 1, kind: input, shape index: {}]   ;;  %s4515_s2 = inlined_call_operand.vmem [shape: f32[48,8,64], index: 2, kind: input, shape index: {}]   ;;  %s4516_s3 = inlined_call_operand.vmem [shape: f32[64,256], index: 3, kind: input, shape index: {}]   ;;  %s4517_s4 = inlined_call_operand.vmem [shape: f32[64,64], index: 4, kind: input, shape index: {}]   ;;  %s4518_s5 = inlined_call_operand.vmem [shape: f32[64,192], index: 5, kind: input, shape index: {}]   ;;  %s4519_s6 = inlined_call_operand.vmem [shape: f32[192,192], index: 6, kind: input, shape index: {}]   ;;  %s4520_s7 = inlined_call_operand.vmem [shape: f32[1,64], index: 7, kind: input, shape index: {}]   ;;  %s4521_s8 = inlined_call_operand.vmem [shape: f32[1,64], index: 8, kind: input, shape index: {}]   ;;  %s4522_s9 = inlined_call_operand.vmem [shape: f32[1,192], index: 9, kind: input, shape index: {}]   ;;  %s4523_s10 = inlined_call_operand.vmem [shape: f32[1,192], index: 10, kind: input, shape index: {}]   ;;  %s4524_s11 = inlined_call_operand.vmem [shape: f32[1,192], index: 11, kind: input, shape index: {}]   ;;  %s4525_s12 = inlined_call_operand.vmem [shape: f32[1,192], index: 12, kind: input, shape index: {}]   ;;  %s4526_s13 = inlined_call_operand.vmem [shape: f32[1,64], index: 13, kind: input, shape index: {}]   ;;  %s4527_s14 = inlined_call_operand.vmem [shape: f32[1,64], index: 14, kind: input, shape index: {}]   ;;  %s4528_s15 = inlined_call_operand.vmem [shape: f32[48,128], index: 15, kind: output, shape index: {}]  }
   0x1 LB: > { %s2527_s19 = sadd.s32 4294967295, %s2742_s18   ;;  %p2531_p0 = scmp.ge.s32.totalorder %s2742_s18, 1  ;;  %s2742_s18 = sphi %s2825_s18, %s25_s18  }
   0x2   : > { %p460_p1 = scmp.lt.s32.totalorder %s2742_s18, 4 }
   0x4   : > { %p461_p2 = pnand %p2531_p0, %p460_p1 }
   0x5   : > { %s2532_s26 = sshll.u32 (!%p461_p2), %s2527_s19, 1  ;;  %s2534_s27 = sshll.u32 (!%p461_p2), %s2527_s19, 4 }
   0x6   : > { %464 = sbr.rel (%p461_p2) target bundleno = 1857 (0x741), region = 80  ;;  %p519_p3 = scmp.lt.s32.totalorder (!%p461_p2), %s2532_s26, 5 }
   0x7   : > { %p525_p4 = scmp.lt.s32.totalorder (!%p461_p2), %s2534_s27, 47 }
   0xb   : > { %v591_v0 = vld [vmem:[%s4516_s3 + $0x78] sm:$0xff]  ;;  %v589_v2 = vld [vmem:[%s4516_s3 + $0x68] sm:$0xff]  ;;  %v2848_v3 = vld [vmem:[%s4517_s4 + $0x30] sm:$0xff]  ;;  %s4585_s26 = smov (!%p519_p3, %s2532_s26), 5  ;;  %s4587_s27 = smov (!%p525_p4, %s2534_s27), 47  ;;  %vm592_vm0 = vcmask 523264  }
   0xc   : > { %v2839_v1 = vld [vmem:[%s4517_s4 + $0x38] sm:$0xff]  ;;  %630 = vmatpush.msra.mxu1 %v591_v0  ;;  %v2856_v5 = vld [vmem:[%s4517_s4 + $0x28] sm:$0xff]  ;;  %v590_v6 = vld [vmem:[%s4516_s3 + $0x70] sm:$0xff]  ;;  %s2533_s28 = sshll.u32 %s4585_s26, 3  ;;  %s4529_s29 = sshll.u32 %s4587_s27, 3  ;;  %vm1798_vm1 = vcmask 1041409  }
   0xd   : > { %2590 = vmatpush.msra.mxu2 %v2839_v1  ;;  %v587_v4 = vld [vmem:[%s4516_s3 + $0x58] sm:$0xff]  ;;  %v585_v7 = vld [vmem:[%s4516_s3 + $0x48] sm:$0xff]  ;;  %v2870_v8 = vld [vmem:[%s4517_s4 + $0x20] sm:$0xff]  ;;  %607 = vmatpush.msra.mxu0 %v590_v6  ;;  %s2920_s17 = scalar_lea.vmem %s4514_s1, %s4529_s29  ;;  %s2928_s21 = scalar_lea.vmem %s4513_s0, %s2533_s28  ;;  %vm1800_vm2 = vcmask 1042434   ;;  %vm1802_vm3 = vcmask 1043459   ;;  %vm4533_vm4 = vcmask 1044484  }
   0xe   : > { %631 = vmatpush.msra.mxu1 %v589_v2  ;;  %v588_v9 = vld [vmem:[%s4516_s3 + $0x60] sm:$0xff]  ;;  %v1780_v10 = vld [vmem:[%s4518_s5 + $0x70] sm:$0xff]  ;;  %v583_v12 = vld [vmem:[%s4516_s3 + $0x38] sm:$0xff]  ;;  %vm4532_vm5 = vcmask 1045509   ;;  %vm4531_vm6 = vcmask 1046534   ;;  %vm4530_vm7 = vcmask 1047559   ;;  %s540_s22 = scalar_lea.vmem %s4528_s15, %s2533_s28 }
   0xf   : > { %2591 = vmatpush.msra.mxu2 %v2848_v3  ;;  %v586_v11 = vld [vmem:[%s4516_s3 + $0x50] sm:$0xff]  ;;  %v2890_v13 = vld [vmem:[%s4517_s4 + $0x18] sm:$0xff]  ;;  %608 = vmatpush.msra.mxu0 %v588_v9  ;;  %v1778_v14 = vld [vmem:[%s4518_s5 + $0x60] sm:$0xff]  ;;  %s4554_s29 = sshll.u32 %s4587_s27, 3 }
  0x10   : > { %632 = vmatpush.msra.mxu1 %v587_v4  ;;  %1831 = vmatpush.msra.mxu3 %v1780_v10  ;;  %v584_v15 = vld [vmem:[%s4516_s3 + $0x40] sm:$0xff]  ;;  %v1776_v16 = vld [vmem:[%s4518_s5 + $0x50] sm:$0xff]  ;;  %v581_v17 = vld [vmem:[%s4516_s3 + $0x28] sm:$0xff]  ;;  %s4211_s24 = scalar_lea.vmem %s4515_s2, %s4554_s29 }
  0x11   : > { %2592 = vmatpush.msra.mxu2 %v2856_v5  ;;  %v2910_v18 = vld [vmem:[%s4517_s4 + $0x10] sm:$0xff]  ;;  %v579_v19 = vld [vmem:[%s4516_s3 + $0x18] sm:$0xff]  ;;  %609 = vmatpush.msra.mxu0 %v586_v11  ;;  %v548_v20 = vld [vmem:[%s2920_s17 + $0x20] sm:$0xff] }
  0x12   : > { %633 = vmatpush.msra.mxu1 %v585_v7  ;;  %1832 = vmatpush.msra.mxu3 %v1778_v14  ;;  %v582_v21 = vld [vmem:[%s4516_s3 + $0x30] sm:$0xff]  ;;  %v1774_v22 = vld [vmem:[%s4518_s5 + $0x40] sm:$0xff]  ;;  %v2940_v23 = vld [vmem:[%s4517_s4 + $0x8] sm:$0xff]  ;;  %v1682_v25 = vsel %vm592_vm0, %v548_v20, 0.0 }
  0x13   : > { %2593 = vmatpush.msra.mxu2 %v2870_v8  ;;  %v577_v24 = vld [vmem:[%s4516_s3 + $0x8] sm:$0xff]  ;;  %610 = vmatpush.msra.mxu0 %v584_v15  ;;  %v2953_v27 = vld [vmem:[%s4517_s4] sm:$0xff]  ;;  %v1683_v28 = vrot.slane %v1682_v25, 4  ;;  %v1772_v30 = vld [vmem:[%s4518_s5 + $0x30] sm:$0xff] }
  0x14   : > { %634 = vmatpush.msra.mxu1 %v583_v12  ;;  %1833 = vmatpush.msra.mxu3 %v1776_v16  ;;  %v2947_v26 = vld [vmem:[%s2920_s17 + $0x28] sm:$0xff]  ;;  %v580_v29 = vld [vmem:[%s4516_s3 + $0x20] sm:$0xff]  ;;  %v2974_v37 = vld [vmem:[%s2920_s17 + $0x10] sm:$0xff] }
  0x15   : > { %2594 = vmatpush.msra.mxu2 %v2890_v13  ;;  %v1689_v31 = vsel %vm592_vm0, %v2947_v26, 0.0  ;;  %v2964_v32 = vld [vmem:[%s2928_s21] sm:$0xff]  ;;  %611 = vmatpush.msra.mxu0 %v582_v21  ;;  %v2970_v35 = vld [vmem:[%s2920_s17 + $0x8] sm:$0xff]  ;;  %v1684_v36 = vadd.f32 %v1683_v28, %v1682_v25  ;;  %v2977_v38 = vld [vmem:[%s2920_s17 + $0x18] sm:$0xff]  ;;  %v1668_v47 = vsel %vm592_vm0, %v2974_v37, 0.0 }
  0x16   : > { %635 = vmatpush.msra.mxu1 %v581_v17  ;;  %1834 = vmatpush.msra.mxu3 %v1774_v22  ;;  %v1690_v33 = vrot.slane %v1689_v31, 4  ;;  %v2967_v34 = vld [vmem:[%s2920_s17] sm:$0xff]  ;;  %v2980_v39 = vld [vmem:[%s2920_s17 + $0x30] sm:$0xff]  ;;  %v1661_v41 = vsel %vm592_vm0, %v2970_v35, 0.0  ;;  %v2990_v44 = vld [vmem:[%s2920_s17 + $0x38] sm:$0xff]  ;;  %v1669_v50 = vrot.slane %v1668_v47, 4 }
  0x17   : > { %2595 = vmatpush.msra.mxu2 %v2910_v18  ;;  %v1654_v40 = vsel %vm592_vm0, %v2967_v34, 0.0  ;;  %612 = vmatpush.msra.mxu0 %v580_v29  ;;  %v578_v42 = vld [vmem:[%s4516_s3 + $0x10] sm:$0xff]  ;;  %v1662_v46 = vrot.slane %v1661_v41, 4  ;;  %v1685_v48 = vrot.slane %v1684_v36, 2  ;;  %v1770_v49 = vld [vmem:[%s4518_s5 + $0x20] sm:$0xff]  ;;  %v1675_v51 = vsel %vm592_vm0, %v2977_v38, 0.0 }
  0x18   : > { %636 = vmatpush.msra.mxu1 %v579_v19  ;;  %1835 = vmatpush.msra.mxu3 %v1772_v30  ;;  %v1691_v43 = vadd.f32 %v1690_v33, %v1689_v31  ;;  %v1655_v45 = vrot.slane %v1654_v40, 4  ;;  %v1696_v52 = vsel %vm592_vm0, %v2980_v39, 0.0  ;;  %v576_v54 = vld [vmem:[%s4516_s3] sm:$0xff]  ;;  %v1676_v57 = vrot.slane %v1675_v51, 4  ;;  %v1768_v59 = vld [vmem:[%s4518_s5 + $0x10] sm:$0xff]  ;;  %v1781_v0 = vld [vmem:[%s4518_s5 + $0x78] sm:$0xff] }
  0x19   : > { %2596 = vmatpush.msra.mxu2 %v2940_v23  ;;  %v1663_v56 = vadd.f32 %v1662_v46, %v1661_v41  ;;  %v1686_v58 = vadd.f32 %v1685_v48, %v1684_v36  ;;  %613 = vmatpush.msra.mxu0 %v578_v42  ;;  %v1670_v60 = vadd.f32 %v1669_v50, %v1668_v47  ;;  %v1697_v61 = vrot.slane %v1696_v52, 4  ;;  %v1766_v7 = vld [vmem:[%s4518_s5] sm:$0xff]  ;;  %v1779_v12 = vld [vmem:[%s4518_s5 + $0x68] sm:$0xff]  ;;  %v1777_v31 = vld [vmem:[%s4518_s5 + $0x58] sm:$0xff] }
  0x1a   : > { %637 = vmatpush.msra.mxu1 %v577_v24  ;;  %v1692_v53 = vrot.slane %v1691_v43, 2  ;;  %v1656_v55 = vadd.f32 %v1655_v45, %v1654_v40  ;;  %v1703_v62 = vsel %vm592_vm0, %v2990_v44, 0.0  ;;  %1836 = vmatpush.msra.mxu3 %v1770_v49  ;;  %v1677_v4 = vadd.f32 %v1676_v57, %v1675_v51  ;;  %v3025_v14 = vld [vmem:[%s2920_s17 + $0x40] sm:$0xff]  ;;  %v3047_v45 = vld [vmem:[%s2920_s17 + $0x50] sm:$0xff] }
  0x1b   : > { %2597 = vmatpush.msra.mxu2 %v2953_v27  ;;  %2542 = vmatmul.msk.f32.vlgmr.msra.gmra.mxu1 %vm592_vm0, %v2964_v32  ;;  %v1687_v6 = vrot.slane %v1686_v58, 1  ;;  %v1671_v9 = vrot.slane %v1670_v60, 2  ;;  %v1698_v10 = vadd.f32 %v1697_v61, %v1696_v52  ;;  %v1704_v11 = vrot.slane %v1703_v62, 4  ;;  %v1773_v52 = vld [vmem:[%s4518_s5 + $0x38] sm:$0xff]  ;;  %v3069_v61 = vld [vmem:[%s2920_s17 + $0x68] sm:$0xff] }
  0x1c   : > { %2548 = vmatmul.msk.f32.vlgmr.msra.gmra.mxu2 %vm592_vm0, %v548_v20  ;;  %709 = vmatpush.msrb.mxu1 %v2839_v1  ;;  %v1693_v63 = vadd.f32 %v1692_v53, %v1691_v43  ;;  %v1657_v2 = vrot.slane %v1656_v55, 2  ;;  %v1664_v1 = vrot.slane %v1663_v56, 2  ;;  %v1678_v17 = vrot.slane %v1677_v4, 2  ;;  %v543_v20 = vld [vmem:[%s2928_s21 + $0x8] sm:$0xff]  ;;  %v3057_v53 = vld [vmem:[%s2920_s17 + $0x58] sm:$0xff] }
  0x1d   : > { %614 = vmatpush.msra.mxu0 %v576_v54  ;;  %1837 = vmatpush.msra.mxu3 %v1768_v59  ;;  %v1688_v19 = vadd.f32 %v1687_v6, %v1686_v58  ;;  %v1672_v21 = vadd.f32 %v1671_v9, %v1670_v60  ;;  %v1699_v22 = vrot.slane %v1698_v10, 2  ;;  %v1705_v24 = vadd.f32 %v1704_v11, %v1703_v62  ;;  %v3060_v54 = vld [vmem:[%s2920_s17 + $0x60] sm:$0xff]  ;;  %v3082_v9 = vld [vmem:[%s2920_s17 + $0x70] sm:$0xff] }
  0x1e   : > { %710 = vmatpush.msrb.mxu1 %v2848_v3  ;;  %v1694_v15 = vrot.slane %v1693_v63, 1  ;;  %2540 = vmatmul.msk.f32.vlgmr.msra.gmra.mxu0 %vm592_vm0, %v2964_v32  ;;  %v1658_v3 = vadd.f32 %v1657_v2, %v1656_v55  ;;  %v1665_v16 = vadd.f32 %v1664_v1, %v1663_v56  ;;  %v1679_v30 = vadd.f32 %v1678_v17, %v1677_v4  ;;  %v3035_v32 = vld [vmem:[%s2920_s17 + $0x48] sm:$0xff] }
  0x1f   : > { %1854 = vmatpush.msrb.mxu0 %v1781_v0  ;;  %1838 = vmatpush.msra.mxu3 %v1766_v7  ;;  %v1700_v33 = vadd.f32 %v1699_v22, %v1698_v10  ;;  %v1706_v36 = vrot.slane %v1705_v24, 2  ;;  %v1710_v40 = vsel %vm592_vm0, %v3025_v14, 0.0  ;;  %v1724_v59 = vsel %vm592_vm0, %v3047_v45, 0.0 }
  0x20   : > { %711 = vmatpush.msrb.mxu1 %v2856_v5  ;;  %v1695_v25 = vadd.f32 %v1694_v15, %v1693_v63  ;;  %v1659_v28 = vrot.slane %v1658_v3, 1  ;;  %v1666_v29 = vrot.slane %v1665_v16, 1  ;;  %v1673_v5 = vrot.slane %v1672_v21, 1  ;;  %v1769_v15 = vld [vmem:[%s4518_s5 + $0x18] sm:$0xff] }
  0x21   : > { %1855 = vmatpush.msrb.mxu0 %v1779_v12  ;;  %v1680_v43 = vrot.slane %v1679_v30, 1  ;;  %v1711_v46 = vrot.slane %v1710_v40, 4  ;;  %v1701_v48 = vrot.slane %v1700_v33, 1  ;;  %v1707_v49 = vadd.f32 %v1706_v36, %v1705_v24 }
  0x22   : > { %712 = vmatpush.msrb.mxu1 %v2870_v8  ;;  %v1660_v41 = vadd.f32 %v1659_v28, %v1658_v3  ;;  %v1667_v42 = vadd.f32 %v1666_v29, %v1665_v16  ;;  %v1775_v8 = vld [vmem:[%s4518_s5 + $0x48] sm:$0xff]  ;;  %v1674_v47 = vadd.f32 %v1673_v5, %v1672_v21  ;;  %v1725_v0 = vrot.slane %v1724_v59, 4 }
  0x23   : > { %2543 = vmatmul.msk.f32.gmra.mxu1 %vm592_vm0, %v543_v20  ;;  %1856 = vmatpush.msrb.mxu0 %v1777_v31  ;;  %v1681_v50 = vadd.f32 %v1680_v43, %v1679_v30  ;;  %v1702_v56 = vadd.f32 %v1701_v48, %v1700_v33  ;;  %v1708_v57 = vrot.slane %v1707_v49, 1  ;;  %v1731_v4 = vsel %vm592_vm0, %v3057_v53, 0.0 }
  0x24   : > { %2549 = vmatmul.msk.f32.gmra.mxu2 %vm592_vm0, %v2947_v26  ;;  %713 = vmatpush.msrb.mxu1 %v2890_v13  ;;  %v1717_v26 = vsel %vm592_vm0, %v3035_v32, 0.0  ;;  %v1799_v51 = vsel %vm1798_vm1, %v1667_v42, %v1660_v41  ;;  %v1712_v13 = vadd.f32 %v1711_v46, %v1710_v40  ;;  %v1738_v6 = vsel %vm592_vm0, %v3060_v54, 0.0 }
  0x25   : > { %v1718_v55 = vrot.slane %v1717_v26, 4  ;;  %v1801_v58 = vsel %vm1800_vm2, %v1674_v47, %v1799_v51  ;;  %1857 = vmatpush.msrb.mxu0 %v1775_v8  ;;  %v1709_v2 = vadd.f32 %v1708_v57, %v1707_v49  ;;  %v1726_v12 = vadd.f32 %v1725_v0, %v1724_v59 }
  0x26   : > { %714 = vmatpush.msrb.mxu1 %v2910_v18  ;;  %v1803_v60 = vsel %vm1802_vm3, %v1681_v50, %v1801_v58  ;;  %2541 = vmatmul.msk.f32.gmra.mxu0 %vm592_vm0, %v543_v20  ;;  %v1713_v62 = vrot.slane %v1712_v13, 2  ;;  %v1771_v18 = vld [vmem:[%s4518_s5 + $0x28] sm:$0xff]  ;;  %v1732_v3 = vrot.slane %v1731_v4, 4  ;;  %v1739_v16 = vrot.slane %v1738_v6, 4  ;;  %v3097_v20 = vld [vmem:[%s2920_s17 + $0x78] sm:$0xff]  ;;  %s2744_s17 = smov 64  }
  0x27   : > { %v1719_v63 = vadd.f32 %v1718_v55, %v1717_v26  ;;  %v1805_v1 = vsel %vm4533_vm4, %v1688_v19, %v1803_v60  ;;  %1858 = vmatpush.msrb.mxu0 %v1773_v52  ;;  %v1745_v17 = vsel %vm592_vm0, %v3069_v61, 0.0  ;;  %v1727_v24 = vrot.slane %v1726_v12, 2 }
  0x28   : > { %715 = vmatpush.msrb.mxu1 %v2940_v23  ;;  %v1807_v7 = vsel %vm4532_vm5, %v1695_v25, %v1805_v1  ;;  %v1714_v10 = vadd.f32 %v1713_v62, %v1712_v13  ;;  %v1733_v25 = vadd.f32 %v1732_v3, %v1731_v4  ;;  %v1740_v28 = vadd.f32 %v1739_v16, %v1738_v6  ;;  %v3185_v3 = vld [vmem:[%s4519_s6 + $0xd0] sm:$0xff] }
  0x29   : > { %v1720_v11 = vrot.slane %v1719_v63, 2  ;;  %v1809_v23 = vsel %vm4531_vm6, %v1702_v56, %v1807_v7  ;;  %1859 = vmatpush.msrb.mxu0 %v1771_v18  ;;  %v1746_v29 = vrot.slane %v1745_v17, 4  ;;  %v1728_v31 = vadd.f32 %v1727_v24, %v1726_v12  ;;  %v3190_v16 = vld [vmem:[%s4519_s6 + $0x150] sm:$0xff]  ;;  %v3218_v24 = vld [vmem:[%s4519_s6 + $0xc8] sm:$0xff] }
  0x2a   : > { %716 = vmatpush.msrb.mxu1 %v2953_v27  ;;  %v1811_v19 = vsel %vm4530_vm7, %v1709_v2, %v1809_v23  ;;  %v1715_v21 = vrot.slane %v1714_v10, 1  ;;  %v1767_v27 = vld [vmem:[%s4518_s5 + $0x8] sm:$0xff]  ;;  %v1734_v33 = vrot.slane %v1733_v25, 2  ;;  %v1741_v36 = vrot.slane %v1740_v28, 2 }
  0x2b   : > { %2544 = vmatmul.msk.f32.vlgmr.msrb.gmra.mxu1 %vm592_vm0, %v2967_v34  ;;  %v1721_v22 = vadd.f32 %v1720_v11, %v1719_v63  ;;  %2576 = vmatmul.msk.f32.vlgmr.msra.gmra.mxu3 %vm592_vm0, %v1811_v19  ;;  %v1752_v34 = vsel %vm592_vm0, %v3082_v9, 0.0  ;;  %v1747_v40 = vadd.f32 %v1746_v29, %v1745_v17  ;;  %v1759_v41 = vsel %vm592_vm0, %v3097_v20, 0.0  ;;  %v3179_v23 = vld [vmem:[%s4519_s6 + $0xe8] sm:$0xff]  ;;  %v3197_v17 = vld [vmem:[%s4519_s6 + $0xd8] sm:$0xff]  ;;  %v3244_v29 = vld [vmem:[%s4519_s6 + $0xa0] sm:$0xff] }
  0x2c   : > { %2550 = vmatmul.msk.f32.gmra.mxu2 %vm592_vm0, %v2980_v39  ;;  %1860 = vmatpush.msrb.mxu0 %v1769_v15  ;;  %v1716_v30 = vadd.f32 %v1715_v21, %v1714_v10  ;;  %v1753_v5 = vrot.slane %v1752_v34, 4  ;;  %v1729_v43 = vrot.slane %v1728_v31, 1  ;;  %v1760_v46 = vrot.slane %v1759_v41, 4  ;;  %v3174_v15 = vld [vmem:[%s4519_s6 + $0x160] sm:$0xff] }
  0x2d   : > { %v1722_v39 = vrot.slane %v1721_v22, 1  ;;  %v1735_v47 = vadd.f32 %v1734_v33, %v1733_v25  ;;  %v1742_v48 = vadd.f32 %v1741_v36, %v1740_v28  ;;  %v1748_v49 = vrot.slane %v1747_v40, 2  ;;  %v3232_v25 = vld [vmem:[%s4519_s6 + $0x130] sm:$0xff]  ;;  %v3237_v28 = vld [vmem:[%s4519_s6 + $0xb8] sm:$0xff]  ;;  %v3280_v36 = vld [vmem:[%s4519_s6 + $0x80] sm:$0xff] }
  0x2e   : > { %1861 = vmatpush.msrb.mxu0 %v1767_v27  ;;  %v1754_v8 = vadd.f32 %v1753_v5, %v1752_v34  ;;  %v1730_v26 = vadd.f32 %v1729_v43, %v1728_v31  ;;  %v1761_v51 = vadd.f32 %v1760_v46, %v1759_v41  ;;  %v3224_v27 = vld [vmem:[%s4519_s6 + $0xb0] sm:$0xff]  ;;  %v3250_v34 = vld [vmem:[%s4519_s6 + $0x120] sm:$0xff]  ;;  %v3273_v5 = vld [vmem:[%s4519_s6 + $0x98] sm:$0xff] }
  0x2f   : > { %v1723_v42 = vadd.f32 %v1722_v39, %v1721_v22  ;;  %2578 = vmatmul.msk.f32.vlgmr.msrb.gmra.mxu0 %vm592_vm0, %v1811_v19  ;;  %v1736_v13 = vrot.slane %v1735_v47, 1  ;;  %v1743_v55 = vrot.slane %v1742_v48, 1  ;;  %v1749_v56 = vadd.f32 %v1748_v49, %v1747_v40  ;;  %v3213_v22 = vld [vmem:[%s4519_s6 + $0x140] sm:$0xff]  ;;  %v3262_v39 = vld [vmem:[%s4519_s6 + $0x90] sm:$0xff] }
  0x30   : > { %v1755_v50 = vrot.slane %v1754_v8, 2  ;;  %v1762_v58 = vrot.slane %v1761_v51, 2  ;;  %v3268_v31 = vld [vmem:[%s4519_s6 + $0x110] sm:$0xff] }
  0x31   : > { %v1812_v52 = vsel %vm1798_vm1, %v1723_v42, %v1716_v30  ;;  %v1737_v60 = vadd.f32 %v1736_v13, %v1735_v47  ;;  %v1744_v62 = vadd.f32 %v1743_v55, %v1742_v48  ;;  %v1750_v63 = vrot.slane %v1749_v56, 1  ;;  %v3255_v30 = vld [vmem:[%s4519_s6 + $0xa8] sm:$0xff]  ;;  %v3287_v42 = vld [vmem:[%s4519_s6 + $0x100] sm:$0xff]  ;;  %v3327_v13 = vld [vmem:[%s4519_s6 + $0x178] sm:$0xff] }
  0x32   : > { %v1756_v57 = vadd.f32 %v1755_v50, %v1754_v8  ;;  %v1813_v59 = vsel %vm1800_vm2, %v1730_v26, %v1812_v52  ;;  %v1763_v18 = vadd.f32 %v1762_v58, %v1761_v51  ;;  %v3296_v8 = vld [vmem:[%s4519_s6 + $0x88] sm:$0xff]  ;;  %v3316_v51 = vld [vmem:[%s4519_s6 + $0x70] sm:$0xff]  ;;  %v3322_v52 = vld [vmem:[%s4519_s6 + $0x78] sm:$0xff] }
  0x33   : > { %2545 = vmatmul.msk.f32.gmra.mxu1 %vm592_vm0, %v2970_v35  ;;  %v1751_v2 = vadd.f32 %v1750_v63, %v1749_v56  ;;  %v1814_v1 = vsel %vm1802_vm3, %v1737_v60, %v1813_v59  ;;  %v3332_v55 = vld [vmem:[%s4519_s6 + $0x60] sm:$0xff]  ;;  %v3339_v56 = vld [vmem:[%s4519_s6 + $0x68] sm:$0xff]  ;;  %v3349_v58 = vld [vmem:[%s4519_s6 + $0x50] sm:$0xff] }
  0x34   : > { %2551 = vmatmul.msk.f32.gmra.mxu2 %vm592_vm0, %v2990_v44  ;;  %v1757_v0 = vrot.slane %v1756_v57, 1  ;;  %v1764_v6 = vrot.slane %v1763_v18, 1  ;;  %v1815_v7 = vsel %vm4533_vm4, %v1744_v62, %v1814_v1  ;;  %v3355_v59 = vld [vmem:[%s4519_s6 + $0x58] sm:$0xff]  ;;  %v3367_v62 = vld [vmem:[%s4519_s6 + $0x40] sm:$0xff]  ;;  %v3373_v63 = vld [vmem:[%s4519_s6 + $0x48] sm:$0xff] }
  0x35   : > { %v1816_v10 = vsel %vm4532_vm5, %v1751_v2, %v1815_v7  ;;  %v3360_v60 = vld [vmem:[%s4519_s6 + $0x158] sm:$0xff]  ;;  %v3409_v7 = vld [vmem:[%s4519_s6 + $0x128] sm:$0xff] }
  0x36   : > { %v1758_v4 = vadd.f32 %v1757_v0, %v1756_v57  ;;  %v1765_v11 = vadd.f32 %v1764_v6, %v1763_v18  ;;  %v3344_v57 = vld [vmem:[%s4519_s6 + $0x168] sm:$0xff]  ;;  %v3388_v18 = vld [vmem:[%s4519_s6 + $0x30] sm:$0xff]  ;;  %v1898_v2 = vld [vmem:[%s4519_s6 + $0x38] sm:$0xff] }
  0x37   : > { %v3378_v0 = vld [vmem:[%s4519_s6 + $0x148] sm:$0xff]  ;;  %v3397_v1 = vld [vmem:[%s4519_s6 + $0x138] sm:$0xff] }
  0x38   : > { %v1817_v35 = vsel %vm4531_vm6, %v1758_v4, %v1816_v10  ;;  %v1895_v4 = vld [vmem:[%s4519_s6 + $0x20] sm:$0xff]  ;;  %v1896_v6 = vld [vmem:[%s4519_s6 + $0x28] sm:$0xff]  ;;  %v1893_v10 = vld [vmem:[%s4519_s6 + $0x10] sm:$0xff] }
  0x39   : > { %v1818_v12 = vsel %vm4530_vm7, %v1765_v11, %v1817_v35  ;;  %v1894_v11 = vld [vmem:[%s4519_s6 + $0x18] sm:$0xff] }
  0x3a   : > { %2577 = vmatmul.msk.f32.gmra.mxu3 %vm592_vm0, %v1818_v12  ;;  %2579 = vmatmul.msk.f32.gmra.mxu0 %vm592_vm0, %v1818_v12  ;;  %v3420_v35 = vld [vmem:[%s4519_s6 + $0x118] sm:$0xff]  ;;  %v1891_v12 = vld [vmem:[%s4519_s6] sm:$0xff] }
  0x3b   : > { %2546 = vmatmul.msk.f32.gmra.mxu1 %vm592_vm0, %v2974_v37 }
  0x3c   : > { %2552 = vmatmul.msk.f32.gmra.mxu2 %vm592_vm0, %v3025_v14 }
  0x43   : > { %2547 = vmatmul.msk.f32.gmra.mxu1 %vm592_vm0, %v2977_v38 }
  0x44   : > { %2553 = vmatmul.msk.f32.gmra.mxu2 %vm592_vm0, %v3035_v32 }
  0x4c   : > { %2554 = vmatmul.msk.f32.gmra.mxu2 %vm592_vm0, %v3047_v45 }
  0x54   : > { %2555 = vmatmul.msk.f32.gmra.mxu2 %vm592_vm0, %v3057_v53  ;;  %v3152_v53 = vld [vmem:[%s4519_s6 + $0xf0] sm:$0xff] }
  0x55   : > { %1961 = vmatpush.msra.mxu1 %v3152_v53 }
  0x5c   : > { %2556 = vmatmul.msk.f32.gmra.mxu2 %vm592_vm0, %v3060_v54  ;;  %v3157_v54 = vld [vmem:[%s4519_s6 + $0x170] sm:$0xff] }
  0x5d   : > { %1992 = vmatpush.msrb.mxu3 %v3157_v54 }
  0x5f   : > { %1993 = vmatpush.msrb.mxu3 %v3174_v15 }
  0x61   : > { %1994 = vmatpush.msrb.mxu3 %v3190_v16 }
  0x63   : > { %1995 = vmatpush.msrb.mxu3 %v3213_v22 }
  0x64   : > { %2557 = vmatmul.msk.f32.gmra.mxu2 %vm592_vm0, %v3069_v61  ;;  %v3162_v61 = vld [vmem:[%s4519_s6 + $0xf8] sm:$0xff] }
  0x65   : > { %2007 = vmatpush.msra.mxu0 %v3162_v61  ;;  %1996 = vmatpush.msrb.mxu3 %v3232_v25 }
  0x67   : > { %2008 = vmatpush.msra.mxu0 %v3179_v23  ;;  %1997 = vmatpush.msrb.mxu3 %v3250_v34 }
  0x69   : > { %2009 = vmatpush.msra.mxu0 %v3197_v17  ;;  %1998 = vmatpush.msrb.mxu3 %v3268_v31 }
  0x6b   : > { %2010 = vmatpush.msra.mxu0 %v3218_v24  ;;  %1999 = vmatpush.msrb.mxu3 %v3287_v42 }
  0x6c   : > { %2558 = vmatmul.msk.f32.gmra.mxu2 %vm592_vm0, %v3082_v9  ;;  %v3169_v9 = vld [vmem:[%s4519_s6 + $0xe0] sm:$0xff] }
  0x6d   : > { %1962 = vmatpush.msra.mxu1 %v3169_v9  ;;  %2011 = vmatpush.msra.mxu0 %v3237_v28 }
  0x6e   : > { %2038 = vmatpush.msra.mxu3 %v3327_v13 }
  0x6f   : > { %1963 = vmatpush.msra.mxu1 %v3185_v3  ;;  %2012 = vmatpush.msra.mxu0 %v3255_v30 }
  0x70   : > { %2039 = vmatpush.msra.mxu3 %v3344_v57 }
  0x71   : > { %2013 = vmatpush.msra.mxu0 %v3273_v5 }
  0x72   : > { %2040 = vmatpush.msra.mxu3 %v3360_v60 }
  0x73   : > { %2014 = vmatpush.msra.mxu0 %v3296_v8 }
  0x74   : > { %2559 = vmatmul.msk.f32.gmra.mxu2 %vm592_vm0, %v3097_v20  ;;  %v3203_v20 = vld [vmem:[%s4519_s6 + $0xc0] sm:$0xff]  ;;  %2041 = vmatpush.msra.mxu3 %v3378_v0 }
  0x75   : > { %1964 = vmatpush.msra.mxu1 %v3203_v20  ;;  %2015 = vmatpush.msra.mxu0 %v3322_v52 }
  0x76   : > { %2042 = vmatpush.msra.mxu3 %v3397_v1 }
  0x77   : > { %1965 = vmatpush.msra.mxu1 %v3224_v27  ;;  %2016 = vmatpush.msra.mxu0 %v3339_v56 }
  0x78   : > { %2043 = vmatpush.msra.mxu3 %v3409_v7 }
  0x79   : > { %1966 = vmatpush.msra.mxu1 %v3244_v29  ;;  %2017 = vmatpush.msra.mxu0 %v3355_v59 }
  0x7a   : > { %2044 = vmatpush.msra.mxu3 %v3420_v35 }
  0x7b   : > { %1967 = vmatpush.msra.mxu1 %v3262_v39  ;;  %2018 = vmatpush.msra.mxu0 %v3373_v63 }
  0x7d   : > { %1968 = vmatpush.msra.mxu1 %v3280_v36  ;;  %2019 = vmatpush.msra.mxu0 %v1898_v2 }
  0x7f   : > { %1969 = vmatpush.msra.mxu1 %v3316_v51  ;;  %2020 = vmatpush.msra.mxu0 %v1896_v6 }
  0x81   : > { %1970 = vmatpush.msra.mxu1 %v3332_v55  ;;  %2021 = vmatpush.msra.mxu0 %v1894_v11 }
  0x83   : > { %1971 = vmatpush.msra.mxu1 %v3349_v58 }
  0x85   : > { %1972 = vmatpush.msra.mxu1 %v3367_v62 }
  0x87   : > { %1973 = vmatpush.msra.mxu1 %v3388_v18 }
  0x89   : > { %1974 = vmatpush.msra.mxu1 %v1895_v4 }
  0x8b   : > { %1975 = vmatpush.msra.mxu1 %v1893_v10 }
  0x8d   : > { %1976 = vmatpush.msra.mxu1 %v1891_v12 }
  0x8f   : > { %2099 = vmatpush.msrb.mxu1 %v3152_v53 }
  0x91   : > { %2100 = vmatpush.msrb.mxu1 %v3169_v9 }
  0x93   : > { %2101 = vmatpush.msrb.mxu1 %v3185_v3 }
  0x95   : > { %2102 = vmatpush.msrb.mxu1 %v3203_v20 }
  0x97   : > { %2103 = vmatpush.msrb.mxu1 %v3224_v27 }
  0x98   : > { %v639_v40 = vpop.f32.mrf.mxu1 }
  0x99   : > { %2104 = vmatpush.msrb.mxu1 %v3244_v29 }
  0x9b   : > { %v3141_v37 = vpop.f32.mrf.mxu0  ;;  %2105 = vmatpush.msrb.mxu1 %v3262_v39 }
  0x9d   : > { %2106 = vmatpush.msrb.mxu1 %v3280_v36 }
  0x9f   : > { %2107 = vmatpush.msrb.mxu1 %v3316_v51 }
  0xa0   : > { %v642_v49 = vpop.f32.mrf.mxu1 }
  0xa1   : > { %2108 = vmatpush.msrb.mxu1 %v3332_v55 }
  0xa3   : > { %v3143_v38 = vpop.f32.mrf.mxu0  ;;  %2109 = vmatpush.msrb.mxu1 %v3349_v58  ;;  %v768_v58 = vrot.slane %v3141_v37, 1 }
  0xa5   : > { %2110 = vmatpush.msrb.mxu1 %v3367_v62 }
  0xa7   : > { %2111 = vmatpush.msrb.mxu1 %v3388_v18 }
  0xa9   : > { %2112 = vmatpush.msrb.mxu1 %v1895_v4  ;;  %v775_v4 = vrot.slane %v3143_v38, 1 }
  0xab   : > { %2113 = vmatpush.msrb.mxu1 %v1893_v10  ;;  %v791_v10 = vperm.slane %v775_v4, 0 }
  0xac   : > { %v1863_v14 = vpop.f32.mrf.mxu0 }
  0xad   : > { %2114 = vmatpush.msrb.mxu1 %v1891_v12  ;;  %v790_v12 = vperm.slane %v3143_v38, 0 }
  0xae   : > { %v1840_v44 = vpop.f32.mrf.mxu3 }
  0xaf   : > { %1873 = vrot.lane.b32.xlu0 %v1840_v44, %s2744_s17  ;;  %v1892_v44 = vld [vmem:[%s4519_s6 + $0x8] sm:$0xff] }
  0xb0   : > { %2022 = vmatpush.msra.mxu0 %v1892_v44 }
  0xb2   : > { %2145 = vmatpush.msrb.mxu0 %v3162_v61 }
  0xb4   : > { %2146 = vmatpush.msrb.mxu0 %v3179_v23 }
  0xb6   : > { %2147 = vmatpush.msrb.mxu0 %v3197_v17 }
  0xb7   : > { %1875 = vrot.lane.b32.xlu0 %v1863_v14, %s2744_s17  ;;  %v1866_v45 = vpop.f32.mrf.mxu0  ;;  %v3432_v14 = vld [vmem:[%s4519_s6 + $0x108] sm:$0xff] }
  0xb8   : > { %2045 = vmatpush.msra.mxu3 %v3432_v14  ;;  %2148 = vmatpush.msrb.mxu0 %v3218_v24 }
  0xba   : > { %2149 = vmatpush.msrb.mxu0 %v3237_v28 }
  0xbc   : > { %2150 = vmatpush.msrb.mxu0 %v3255_v30 }
  0xbd   : > { %v1843_v32 = vpop.f32.mrf.mxu3 }
  0xbe   : > { %1877 = vrot.lane.b32.xlu1 %v1843_v32, %s2744_s17  ;;  %2151 = vmatpush.msrb.mxu0 %v3273_v5 }
  0xc0   : > { %2152 = vmatpush.msrb.mxu0 %v3296_v8 }
  0xc2   : > { %2153 = vmatpush.msrb.mxu0 %v3322_v52 }
  0xc4   : > { %2154 = vmatpush.msrb.mxu0 %v3339_v56 }
  0xc6   : > { %1879 = vrot.lane.b32.xlu1 %v1866_v45, %s2744_s17  ;;  %2155 = vmatpush.msrb.mxu0 %v3355_v59  ;;  %v769_v59 = vrot.slane %v3141_v37, 2 }
  0xc8   : > { %2156 = vmatpush.msrb.mxu0 %v3373_v63  ;;  %v784_v18 = vperm.slane %v769_v59, 0  ;;  %v781_v59 = vrot.slane %v3143_v38, 7 }
  0xca   : > { %2157 = vmatpush.msrb.mxu0 %v1898_v2 }
  0xcc   : > { %2158 = vmatpush.msrb.mxu0 %v1896_v6  ;;  %v770_v6 = vrot.slane %v3141_v37, 3 }
  0xce   : > { %2159 = vmatpush.msrb.mxu0 %v1894_v11 }
  0xd0   : > { %2160 = vmatpush.msrb.mxu0 %v1892_v44  ;;  %v785_v44 = vperm.slane %v770_v6, 0 }
 0x121   : > { %v1874_v19 = vpop.permute.xlu0 %1873 }
 0x122   : > { %v3206_v21 = vadd.f32 %v1874_v19, %v3141_v37 }
 0x124   : > { %1945 = vrot.lane.b32.xlu0 %v3206_v21, %s2744_s17 }
 0x129   : > { %v1876_v33 = vpop.permute.xlu0 %1875 }
 0x12a   : > { %v1881_v41 = vsel %vm592_vm0, %v1874_v19, %v1876_v33 }
 0x12b   : > { %v3289_v43 = vadd.f32 %v1881_v41, %v639_v40 }
 0x12d   : > { %1947 = vrot.lane.b32.xlu2 %v3289_v43, %s2744_s17 }
 0x130   : > { %v1878_v46 = vpop.permute.xlu1 %1877 }
 0x131   : > { %v3304_v47 = vadd.f32 %v1878_v46, %v3143_v38 }
 0x133   : > { %1949 = vrot.lane.b32.xlu1 %v3304_v47, %s2744_s17 }
 0x138   : > { %v1880_v48 = vpop.permute.xlu1 %1879 }
 0x139   : > { %v1882_v26 = vsel %vm592_vm0, %v1878_v46, %v1880_v48 }
 0x13a   : > { %v3309_v50 = vadd.f32 %v1882_v26, %v642_v49 }
 0x13c   : > { %1951 = vrot.lane.b32.xlu2 %v3309_v50, %s2744_s17 }
 0x187   : > { %v1948_v32 = vpop.permute.xlu2 %1947 }
 0x188   : > { %2580 = vmatmul.msk.f32.vlgmr.msrb.gmra.mxu3 %vm592_vm0, %v1948_v32 }
 0x189   : > { %2130 = vmatpush.msrb.mxu3 %v3157_v54 }
 0x18b   : > { %2131 = vmatpush.msrb.mxu3 %v3174_v15  ;;  %v718_v15 = vpop.f32.mrf.mxu1 }
 0x18d   : > { %2132 = vmatpush.msrb.mxu3 %v3190_v16 }
 0x18f   : > { %2133 = vmatpush.msrb.mxu3 %v3213_v22 }
 0x191   : > { %2134 = vmatpush.msrb.mxu3 %v3232_v25 }
 0x193   : > { %2135 = vmatpush.msrb.mxu3 %v3250_v34  ;;  %v721_v23 = vpop.f32.mrf.mxu1 }
 0x195   : > { %2136 = vmatpush.msrb.mxu3 %v3268_v31  ;;  %v730_v31 = vpop.f32.mrf.mxu2 }
 0x196   : > { %v1946_v45 = vpop.permute.xlu0 %1945  ;;  %v1952_v53 = vpop.permute.xlu2 %1951 }
 0x197   : > { %v1953_v54 = vsel %vm592_vm0, %v1946_v45, %v1948_v32  ;;  %2137 = vmatpush.msrb.mxu3 %v3287_v42 }
 0x198   : > { %2581 = vmatmul.msk.f32.gmra.mxu3 %vm592_vm0, %v1952_v53  ;;  %1977 = vmatmul.f32.vlgmr.msra.gmra.mxu1 %v1953_v54 }
 0x199   : > { %2023 = vmatmul.f32.vlgmr.msra.gmra.mxu0 %v1953_v54 }
 0x19b   : > { %v724_v3 = vpop.f32.mrf.mxu1 }
 0x19d   : > { %v3489_v5 = vpop.f32.mrf.mxu2 }
 0x1a0   : > { %2582 = vmatmul.msk.f32.vlgmr.msra.gmra.mxu3 %vm592_vm0, %v1948_v32  ;;  %v771_v32 = vrot.slane %v3141_v37, 4 }
 0x1a1   : > { %2176 = vmatpush.msra.mxu3 %v3327_v13 }
 0x1a3   : > { %2177 = vmatpush.msra.mxu3 %v3344_v57  ;;  %v3483_v16 = vpop.f32.mrf.mxu1 }
 0x1a4   : > { %v3544_v54 = vadd.f32 %v785_v44, %v3483_v16 }
 0x1a5   : > { %2178 = vmatpush.msra.mxu3 %v3360_v60  ;;  %v1950_v61 = vpop.permute.xlu1 %1949  ;;  %v3491_v33 = vpop.f32.mrf.mxu2  ;;  %v782_v60 = vperm.slane %v3141_v37, 0 }
 0x1a6   : > { %v1954_v9 = vsel %vm592_vm0, %v1950_v61, %v1952_v53  ;;  %v776_v61 = vrot.slane %v3143_v38, 2 }
 0x1a7   : > { %2179 = vmatpush.msra.mxu3 %v3378_v0  ;;  %1980 = vmatmul.f32.gmra.mxu1 %v1954_v9  ;;  %v3523_v63 = vadd.f32 %v782_v60, %v718_v15  ;;  %v783_v0 = vperm.slane %v768_v58, 0 }
 0x1a8   : > { %2026 = vmatmul.f32.gmra.mxu0 %v1954_v9  ;;  %2583 = vmatmul.msk.f32.gmra.mxu3 %vm592_vm0, %v1952_v53  ;;  %v777_v9 = vrot.slane %v3143_v38, 3 }
 0x1a9   : > { %2180 = vmatpush.msra.mxu3 %v3397_v1  ;;  %v3525_v2 = vadd.f32 %v783_v0, %v721_v23  ;;  %v3527_v1 = vadd.f32 %v784_v18, %v724_v3  ;;  %v786_v23 = vperm.slane %v771_v32, 0  ;;  %v841_v3 = vsel %vm592_vm0, %v3544_v54, 0.0 }
 0x1aa   : > { %v793_v16 = vperm.slane %v777_v9, 0  ;;  %v797_v18 = vperm.slane %v781_v59, 0 }
 0x1ab   : > { %2181 = vmatpush.msra.mxu3 %v3409_v7  ;;  %v832_v7 = vsel %vm592_vm0, %v3523_v63, 0.0  ;;  %v838_v11 = vsel %vm592_vm0, %v3527_v1, 0.0 }
 0x1ad   : > { %2182 = vmatpush.msra.mxu3 %v3420_v35  ;;  %v3493_v41 = vpop.f32.mrf.mxu2  ;;  %v835_v35 = vsel %vm592_vm0, %v3525_v2, 0.0 }
 0x1af   : > { %2183 = vmatpush.msra.mxu3 %v3432_v14 }
 0x20b   : > { %v2001_v17 = vpop.f32.mrf.mxu3 }
 0x215   : > { %v1978_v19 = vpop.f32.mrf.mxu1 }
 0x216   : > { %v2002_v20 = vadd.f32 %v2001_v17, %v1978_v19  ;;  %v2024_v24 = vpop.f32.mrf.mxu0  ;;  %v792_v19 = vperm.slane %v776_v61, 0 }
 0x218   : > { %2057 = vrot.lane.b32.xlu2 %v2002_v20, %s2744_s17  ;;  %v3554_v20 = vadd.f32 %v786_v23, %v730_v31 }
 0x21b   : > { %v2004_v22 = vpop.f32.mrf.mxu3 }
 0x223   : > { %v2047_v27 = vpop.f32.mrf.mxu3 }
 0x224   : > { %v2048_v25 = vadd.f32 %v2047_v27, %v2024_v24  ;;  %v1981_v28 = vpop.f32.mrf.mxu1 }
 0x225   : > { %v2005_v29 = vadd.f32 %v2004_v22, %v1981_v28  ;;  %v2027_v34 = vpop.f32.mrf.mxu0  ;;  %v772_v22 = vrot.slane %v3141_v37, 5 }
 0x226   : > { %2059 = vrot.lane.b32.xlu0 %v2048_v25, %s2744_s17  ;;  %v778_v25 = vrot.slane %v3143_v38, 4 }
 0x227   : > { %2061 = vrot.lane.b32.xlu1 %v2005_v29, %s2744_s17  ;;  %v773_v29 = vrot.slane %v3141_v37, 6 }
 0x22b   : > { %v2050_v30 = vpop.f32.mrf.mxu3 }
 0x22c   : > { %v2051_v39 = vadd.f32 %v2050_v30, %v2027_v34  ;;  %v844_v34 = vsel %vm592_vm0, %v3554_v20, 0.0  ;;  %v787_v30 = vperm.slane %v772_v22, 0 }
 0x22e   : > { %2063 = vrot.lane.b32.xlu2 %v2051_v39, %s2744_s17  ;;  %v794_v39 = vperm.slane %v778_v25, 0 }
 0x272   : > { %v2058_v36 = vpop.permute.xlu2 %2057 }
 0x273   : > { %v3496_v42 = vsub.f32 %v3206_v21, %v2058_v36 }
 0x275   : > { %v2075_v21 = vmul.f32 %v3496_v42, %v3496_v42 }
 0x288   : > { %v2064_v46 = vpop.permute.xlu2 %2063 }
 0x298   : > { %v2060_v40 = vpop.permute.xlu0 %2059 }
 0x299   : > { %v2065_v8 = vsel %vm592_vm0, %v2058_v36, %v2060_v40  ;;  %v2062_v49 = vpop.permute.xlu1 %2061  ;;  %v788_v40 = vperm.slane %v773_v29, 0 }
 0x29a   : > { %v3500_v48 = vsub.f32 %v3289_v43, %v2065_v8  ;;  %v2066_v26 = vsel %vm592_vm0, %v2062_v49, %v2064_v46  ;;  %v3504_v51 = vsub.f32 %v3304_v47, %v2062_v49  ;;  %v742_v47 = vpop.f32.mrf.mxu2  ;;  %v3572_v46 = vadd.f32 %v787_v30, %v3489_v5 }
 0x29b   : > { %v3507_v52 = vsub.f32 %v3309_v50, %v2066_v26  ;;  %v3541_v53 = vadd.f32 %v790_v12, %v742_v47  ;;  %v3575_v49 = vadd.f32 %v788_v40, %v3491_v33  ;;  %v774_v26 = vrot.slane %v3141_v37, 7 }
 0x29c   : > { %v2076_v13 = vmul.f32 %v3500_v48, %v3500_v48  ;;  %v2077_v55 = vmul.f32 %v3504_v51, %v3504_v51  ;;  %v847_v5 = vsel %vm592_vm0, %v3572_v46, 0.0 }
 0x29d   : > { %v2078_v43 = vmul.f32 %v3507_v52, %v3507_v52  ;;  %v856_v17 = vsel %vm592_vm0, %v3541_v53, 0.0  ;;  %v850_v47 = vsel %vm592_vm0, %v3575_v49, 0.0 }
 0x29e   : > { %2085 = vrot.lane.b32.xlu0 %v2076_v13, %s2744_s17  ;;  %v2607_v56 = vpack.i.bf16 %v2077_v55, %v2075_v21  ;;  %v779_v13 = vrot.slane %v3143_v38, 5  ;;  %v780_v21 = vrot.slane %v3143_v38, 6 }
 0x29f   : > { %2089 = vrot.lane.b32.xlu1 %v2078_v43, %s2744_s17 }
 0x2a0   : > { %2608 = vrot.lane.b32.xlu2 %v2607_v56, %s2744_s17  ;;  %v789_v56 = vperm.slane %v774_v26, 0  ;;  %v795_v33 = vperm.slane %v779_v13, 0 }
 0x2a2   : > { %v745_v50 = vpop.f32.mrf.mxu2  ;;  %v3587_v37 = vadd.f32 %v789_v56, %v3493_v41 }
 0x2a3   : > { %v3538_v14 = vadd.f32 %v791_v10, %v745_v50  ;;  %v796_v50 = vperm.slane %v780_v21, 0 }
 0x2a4   : > { %v853_v60 = vsel %vm592_vm0, %v3587_v37, 0.0 }
 0x2a5   : > { %v859_v15 = vsel %vm592_vm0, %v3538_v14, 0.0 }
 0x2aa   : > { %v748_v57 = vpop.f32.mrf.mxu2 }
 0x2ab   : > { %v3557_v24 = vadd.f32 %v792_v19, %v748_v57 }
 0x2ad   : > { %v862_v36 = vsel %vm592_vm0, %v3557_v24, 0.0 }
 0x2b2   : > { %v751_v62 = vpop.f32.mrf.mxu2 }
 0x2b3   : > { %v3559_v27 = vadd.f32 %v793_v16, %v751_v62 }
 0x2b5   : > { %v865_v31 = vsel %vm592_vm0, %v3559_v27, 0.0 }
 0x2ba   : > { %v754_v45 = vpop.f32.mrf.mxu2 }
 0x2bb   : > { %v3569_v8 = vadd.f32 %v794_v39, %v754_v45 }
 0x2bd   : > { %v868_v55 = vsel %vm592_vm0, %v3569_v8, 0.0 }
 0x2c2   : > { %v757_v28 = vpop.f32.mrf.mxu2 }
 0x2c3   : > { %v3589_v57 = vadd.f32 %v795_v33, %v757_v28 }
 0x2c5   : > { %v871_v0 = vsel %vm592_vm0, %v3589_v57, 0.0 }
 0x2c8   : > { %833 = vadd.xlane.f32.xlu0 %v832_v7 }
 0x2c9   : > { %839 = vadd.xlane.f32.xlu2 %v838_v11  ;;  %836 = vadd.xlane.f32.xlu1 %v835_v35 }
 0x2ca   : > { %v760_v43 = vpop.f32.mrf.mxu2 }
 0x2cb   : > { %v3591_v58 = vadd.f32 %v796_v50, %v760_v43 }
 0x2cd   : > { %v874_v62 = vsel %vm592_vm0, %v3591_v58, 0.0 }
 0x2d0   : > { %860 = vadd.xlane.f32.xlu0 %v859_v15 }
 0x2d1   : > { %842 = vadd.xlane.f32.xlu1 %v841_v3  ;;  %857 = vadd.xlane.f32.xlu2 %v856_v17 }
 0x2d2   : > { %v763_v41 = vpop.f32.mrf.mxu2 }
 0x2d3   : > { %v3600_v4 = vadd.f32 %v797_v18, %v763_v41 }
 0x2d5   : > { %v877_v6 = vsel %vm592_vm0, %v3600_v4, 0.0 }
 0x2d8   : > { %845 = vadd.xlane.f32.xlu0 %v844_v34 }
 0x2d9   : > { %866 = vadd.xlane.f32.xlu1 %v865_v31  ;;  %863 = vadd.xlane.f32.xlu2 %v862_v36 }
 0x2e0   : > { %869 = vadd.xlane.f32.xlu0 %v868_v55 }
 0x2e1   : > { %851 = vadd.xlane.f32.xlu1 %v850_v47  ;;  %848 = vadd.xlane.f32.xlu2 %v847_v5 }
 0x2e8   : > { %854 = vadd.xlane.f32.xlu0 %v853_v60 }
 0x2e9   : > { %875 = vadd.xlane.f32.xlu1 %v874_v62  ;;  %872 = vadd.xlane.f32.xlu2 %v871_v0 }
 0x2f1   : > { %878 = vadd.xlane.f32.xlu2 %v877_v6 }
 0x2fa   : > { %v2609_v38 = vpop.permute.xlu2 %2608 }
 0x2fb   : > { %v2610_v7 = vunpack.i.l.bf16 %v2609_v38  ;;  %v2611_v12 = vunpack.i.h.bf16 %v2609_v38 }
 0x310   : > { %v2086_v10 = vpop.permute.xlu0 %2085 }
 0x311   : > { %2584 = vmatmul.msk.f32.vlgmr.msrb.gmra.mxu3 %vm592_vm0, %v2086_v10  ;;  %v2091_v11 = vsel %vm592_vm0, %v2610_v7, %v2086_v10  ;;  %v2090_v35 = vpop.permute.xlu1 %2089 }
 0x312   : > { %2115 = vmatmul.f32.vlgmr.msrb.gmra.mxu1 %v2091_v11  ;;  %2161 = vmatmul.f32.vlgmr.msrb.gmra.mxu0 %v2091_v11  ;;  %v2092_v44 = vsel %vm592_vm0, %v2611_v12, %v2090_v35 }
 0x319   : > { %2585 = vmatmul.msk.f32.gmra.mxu3 %vm592_vm0, %v2090_v35 }
 0x31a   : > { %2118 = vmatmul.f32.gmra.mxu1 %v2092_v44  ;;  %2164 = vmatmul.f32.gmra.mxu0 %v2092_v44 }
 0x321   : > { %2586 = vmatmul.msk.f32.vlgmr.msra.gmra.mxu3 %vm592_vm0, %v2086_v10 }
 0x329   : > { %2587 = vmatmul.msk.f32.gmra.mxu3 %vm592_vm0, %v2090_v35 }
 0x33b   : > { %v834_v32 = vpop.xlane.xlu0 %833 }
 0x33c   : > { %v880_v45 = vmul.f32 0.015625, %v834_v32  ;;  %v837_v61 = vpop.xlane.xlu1 %836  ;;  %v840_v9 = vpop.xlane.xlu2 %839 }
 0x33d   : > { %v881_v23 = vmul.f32 0.015625, %v837_v61  ;;  %v882_v3 = vmul.f32 0.015625, %v840_v9 }
 0x33e   : > { %v3611_v15 = vsub.f32 %v3523_v63, %v880_v45 }
 0x33f   : > { %v3614_v17 = vsub.f32 %v3525_v2, %v881_v23  ;;  %v3617_v19 = vsub.f32 %v3527_v1, %v882_v3 }
 0x340   : > { %v912_v16 = vmul.f32 %v3611_v15, %v3611_v15 }
 0x341   : > { %v913_v25 = vmul.f32 %v3614_v17, %v3614_v17  ;;  %v914_v63 = vmul.f32 %v3617_v19, %v3617_v19 }
 0x342   : > { %v928_v22 = vsel %vm592_vm0, %v912_v16, 0.0 }
 0x343   : > { %929 = vadd.xlane.f32.xlu0 %v928_v22  ;;  %v861_v28 = vpop.xlane.xlu0 %860  ;;  %v931_v2 = vsel %vm592_vm0, %v913_v25, 0.0  ;;  %v934_v34 = vsel %vm592_vm0, %v914_v63, 0.0 }
 0x344   : > { %v889_v29 = vmul.f32 0.015625, %v861_v28  ;;  %v843_v1 = vpop.xlane.xlu1 %842  ;;  %v858_v30 = vpop.xlane.xlu2 %857  ;;  %932 = vadd.xlane.f32.xlu1 %v931_v2  ;;  %935 = vadd.xlane.f32.xlu2 %v934_v34 }
 0x345   : > { %v883_v31 = vmul.f32 0.015625, %v843_v1  ;;  %v888_v36 = vmul.f32 0.015625, %v858_v30 }
 0x346   : > { %v3629_v39 = vsub.f32 %v3538_v14, %v889_v29 }
 0x347   : > { %v3632_v40 = vsub.f32 %v3544_v54, %v883_v31  ;;  %v3635_v26 = vsub.f32 %v3541_v53, %v888_v36 }
 0x348   : > { %v921_v13 = vmul.f32 %v3629_v39, %v3629_v39 }
 0x349   : > { %v915_v21 = vmul.f32 %v3632_v40, %v3632_v40  ;;  %v920_v55 = vmul.f32 %v3635_v26, %v3635_v26 }
 0x34a   : > { %v955_v53 = vsel %vm592_vm0, %v921_v13, 0.0 }
 0x34b   : > { %v846_v43 = vpop.xlane.xlu0 %845  ;;  %v937_v56 = vsel %vm592_vm0, %v915_v21, 0.0  ;;  %v952_v47 = vsel %vm592_vm0, %v920_v55, 0.0 }
 0x34c   : > { %v884_v14 = vmul.f32 0.015625, %v846_v43  ;;  %v867_v54 = vpop.xlane.xlu1 %866  ;;  %938 = vadd.xlane.f32.xlu2 %v937_v56  ;;  %v864_v5 = vpop.xlane.xlu2 %863  ;;  %953 = vadd.xlane.f32.xlu0 %v952_v47  ;;  %v1939_v43 = vld [vmem:[%s4522_s9] sm:$0x3] }
 0x34d   : > { %v891_v50 = vmul.f32 0.015625, %v867_v54  ;;  %v890_v59 = vmul.f32 0.015625, %v864_v5  ;;  %956 = vadd.xlane.f32.xlu1 %v955_v53  ;;  %v2255_v47 = vperm.slane %v1939_v43, 1 }
 0x34e   : > { %v3647_v33 = vsub.f32 %v3554_v20, %v884_v14  ;;  %v2254_v14 = vperm.slane %v1939_v43, 0 }
 0x34f   : > { %v3650_v60 = vsub.f32 %v3559_v27, %v891_v50  ;;  %v3653_v62 = vsub.f32 %v3557_v24, %v890_v59 }
 0x350   : > { %v916_v0 = vmul.f32 %v3647_v33, %v3647_v33 }
 0x351   : > { %v923_v41 = vmul.f32 %v3650_v60, %v3650_v60  ;;  %v922_v18 = vmul.f32 %v3653_v62, %v3653_v62 }
 0x352   : > { %v940_v24 = vsel %vm592_vm0, %v916_v0, 0.0 }
 0x353   : > { %v870_v20 = vpop.xlane.xlu0 %869  ;;  %v961_v38 = vsel %vm592_vm0, %v923_v41, 0.0  ;;  %v958_v7 = vsel %vm592_vm0, %v922_v18, 0.0 }
 0x354   : > { %v892_v6 = vmul.f32 0.015625, %v870_v20  ;;  %v852_v27 = vpop.xlane.xlu1 %851  ;;  %962 = vadd.xlane.f32.xlu2 %v961_v38  ;;  %v849_v10 = vpop.xlane.xlu2 %848  ;;  %959 = vadd.xlane.f32.xlu0 %v958_v7 }
 0x355   : > { %v886_v35 = vmul.f32 0.015625, %v852_v27  ;;  %v885_v12 = vmul.f32 0.015625, %v849_v10  ;;  %941 = vadd.xlane.f32.xlu1 %v940_v24 }
 0x356   : > { %v3665_v11 = vsub.f32 %v3569_v8, %v892_v6 }
 0x357   : > { %v3668_v44 = vsub.f32 %v3575_v49, %v886_v35  ;;  %v3671_v32 = vsub.f32 %v3572_v46, %v885_v12 }
 0x358   : > { %v924_v45 = vmul.f32 %v3665_v11, %v3665_v11 }
 0x359   : > { %v918_v61 = vmul.f32 %v3668_v44, %v3668_v44  ;;  %v917_v9 = vmul.f32 %v3671_v32, %v3671_v32 }
 0x35a   : > { %v964_v46 = vsel %vm592_vm0, %v924_v45, 0.0 }
 0x35b   : > { %v855_v8 = vpop.xlane.xlu0 %854  ;;  %v946_v3 = vsel %vm592_vm0, %v918_v61, 0.0  ;;  %v943_v16 = vsel %vm592_vm0, %v917_v9, 0.0 }
 0x35c   : > { %v887_v23 = vmul.f32 0.015625, %v855_v8  ;;  %v876_v49 = vpop.xlane.xlu1 %875  ;;  %947 = vadd.xlane.f32.xlu2 %v946_v3  ;;  %v873_v22 = vpop.xlane.xlu2 %872  ;;  %944 = vadd.xlane.f32.xlu0 %v943_v16 }
 0x35d   : > { %v894_v63 = vmul.f32 0.015625, %v876_v49  ;;  %v893_v28 = vmul.f32 0.015625, %v873_v22  ;;  %965 = vadd.xlane.f32.xlu1 %v964_v46 }
 0x35e   : > { %v3683_v25 = vsub.f32 %v3587_v37, %v887_v23 }
 0x35f   : > { %v3686_v29 = vsub.f32 %v3591_v58, %v894_v63  ;;  %v3689_v2 = vsub.f32 %v3589_v57, %v893_v28 }
 0x360   : > { %v919_v34 = vmul.f32 %v3683_v25, %v3683_v25 }
 0x361   : > { %v926_v1 = vmul.f32 %v3686_v29, %v3686_v29  ;;  %v925_v30 = vmul.f32 %v3689_v2, %v3689_v2 }
 0x362   : > { %v949_v58 = vsel %vm592_vm0, %v919_v34, 0.0 }
 0x363   : > { %v970_v37 = vsel %vm592_vm0, %v926_v1, 0.0  ;;  %v967_v31 = vsel %vm592_vm0, %v925_v30, 0.0 }
 0x364   : > { %971 = vadd.xlane.f32.xlu2 %v970_v37  ;;  %v879_v36 = vpop.xlane.xlu2 %878  ;;  %968 = vadd.xlane.f32.xlu0 %v967_v31 }
 0x365   : > { %v895_v57 = vmul.f32 0.015625, %v879_v36  ;;  %950 = vadd.xlane.f32.xlu1 %v949_v58 }
 0x367   : > { %v3701_v13 = vsub.f32 %v3600_v4, %v895_v57 }
 0x369   : > { %v927_v21 = vmul.f32 %v3701_v13, %v3701_v13 }
 0x36b   : > { %v973_v55 = vsel %vm592_vm0, %v927_v21, 0.0 }
 0x36c   : > { %974 = vadd.xlane.f32.xlu0 %v973_v55  ;;  %v1940_v55 = vld [vmem:[%s4523_s10] sm:$0x3] }
 0x37c   : > { %2258 = vrot.lane.b32.xlu2 %v2255_v47, %s2744_s17 }
 0x380   : > { %2256 = vrot.lane.b32.xlu0 %v2254_v14, %s2744_s17 }
 0x38f   : > { %v2116_v56 = vpop.f32.mrf.mxu1  ;;  %v2162_v18 = vpop.f32.mrf.mxu0 }
 0x390   : > { %v2117_v54 = vadd.f32 1e-05, %v2116_v56  ;;  %v2163_v7 = vadd.f32 1e-05, %v2162_v18 }
 0x394   : > { %v2139_v4 = vpop.f32.mrf.mxu3 }
 0x395   : > { %v2140_v5 = vadd.f32 %v2139_v4, %v2117_v54  ;;  %v2269_v54 = vperm.slane %v1940_v55, 1 }
 0x397   : > { %2616 = vrsqrt.f32 %v2140_v5  ;;  %v2119_v53 = vpop.f32.mrf.mxu1  ;;  %vm2197_vm9 = vweird.f32 %v2140_v5  ;;  %v2165_v61 = vpop.f32.mrf.mxu0 }
 0x398   : > { %v2120_v50 = vadd.f32 1e-05, %v2119_v53  ;;  %v2166_v3 = vadd.f32 1e-05, %v2165_v61 }
 0x39c   : > { %v2142_v59 = vpop.f32.mrf.mxu3 }
 0x39d   : > { %v2617_v0 = vpop.eup %2616  ;;  %v2143_v41 = vadd.f32 %v2142_v59, %v2120_v50 }
 0x39e   : > { %v2192_v20 = vmul.f32 %v2617_v0, %v2140_v5  ;;  %vm2198_vm8 = vweird.f32 %v2617_v0 }
 0x39f   : > { %2618 = vrsqrt.f32 %v2143_v41  ;;  %vm2199_vm10 = vmor %vm2197_vm9, %vm2198_vm8  ;;  %vm2217_vm12 = vweird.f32 %v2143_v41 }
 0x3a0   : > { %v2193_v6 = vmul.f32 %v2617_v0, %v2192_v20 }
 0x3a2   : > { %v2194_v38 = vmul.f32 0.5, %v2193_v6 }
 0x3a4   : > { %v2195_v27 = vsub.f32 1.5, %v2194_v38  ;;  %v2185_v10 = vpop.f32.mrf.mxu3 }
 0x3a5   : > { %v2619_v24 = vpop.eup %2618  ;;  %v2186_v35 = vadd.f32 %v2185_v10, %v2163_v7 }
 0x3a6   : > { %v2212_v12 = vmul.f32 %v2619_v24, %v2143_v41  ;;  %v2196_v45 = vmul.f32 %v2617_v0, %v2195_v27  ;;  %vm2218_vm11 = vweird.f32 %v2619_v24 }
 0x3a7   : > { %2620 = vrsqrt.f32 %v2186_v35  ;;  %vm2219_vm13 = vmor %vm2217_vm12, %vm2218_vm11  ;;  %vm2207_vm15 = vweird.f32 %v2186_v35 }
 0x3a8   : > { %v2213_v9 = vmul.f32 %v2619_v24, %v2212_v12  ;;  %v2200_v8 = vsel %vm2199_vm10, %v2617_v0, %v2196_v45 }
 0x3a9   : > { %2235 = vrot.lane.b32.xlu1 %v2200_v8, %s2744_s17 }
 0x3aa   : > { %v2214_v23 = vmul.f32 0.5, %v2213_v9 }
 0x3ac   : > { %v2215_v16 = vsub.f32 1.5, %v2214_v23  ;;  %v2188_v49 = vpop.f32.mrf.mxu3 }
 0x3ad   : > { %v2621_v22 = vpop.eup %2620  ;;  %v2189_v46 = vadd.f32 %v2188_v49, %v2166_v3 }
 0x3ae   : > { %v2202_v63 = vmul.f32 %v2621_v22, %v2186_v35  ;;  %v2216_v28 = vmul.f32 %v2619_v24, %v2215_v16  ;;  %vm2208_vm14 = vweird.f32 %v2621_v22 }
 0x3af   : > { %2622 = vrsqrt.f32 %v2189_v46  ;;  %vm2209_vm8 = vmor %vm2207_vm15, %vm2208_vm14  ;;  %vm2227_vm10 = vweird.f32 %v2189_v46 }
 0x3b0   : > { %v2203_v34 = vmul.f32 %v2621_v22, %v2202_v63  ;;  %v2220_v1 = vsel %vm2219_vm13, %v2619_v24, %v2216_v28 }
 0x3b1   : > { %2239 = vrot.lane.b32.xlu0 %v2220_v1, %s2744_s17 }
 0x3b2   : > { %v2204_v30 = vmul.f32 0.5, %v2203_v34 }
 0x3b4   : > { %v2205_v37 = vsub.f32 1.5, %v2204_v30 }
 0x3b5   : > { %v2623_v31 = vpop.eup %2622 }
 0x3b6   : > { %v2222_v36 = vmul.f32 %v2623_v31, %v2189_v46  ;;  %v930_v58 = vpop.xlane.xlu0 %929  ;;  %v2206_v57 = vmul.f32 %v2621_v22, %v2205_v37  ;;  %vm2228_vm9 = vweird.f32 %v2623_v31 }
 0x3b7   : > { %v976_v21 = vmul.f32 0.015625, %v930_v58  ;;  %v933_v14 = vpop.xlane.xlu1 %932  ;;  %v936_v56 = vpop.xlane.xlu2 %935  ;;  %vm2229_vm11 = vmor %vm2227_vm10, %vm2228_vm9 }
 0x3b8   : > { %v2223_v43 = vmul.f32 %v2623_v31, %v2222_v36  ;;  %v2210_v47 = vsel %vm2209_vm8, %v2621_v22, %v2206_v57  ;;  %v977_v5 = vmul.f32 0.015625, %v933_v14  ;;  %v978_v53 = vmul.f32 0.015625, %v936_v56  ;;  %v3742_v14 = vld [vmem:[%s4520_s7] ss:$0 sm:$0xff] }
 0x3b9   : > { %v992_v4 = vadd.f32 1e-05, %v976_v21  ;;  %2237 = vrot.lane.b32.xlu2 %v2210_v47, %s2744_s17  ;;  %2272 = vrot.lane.b32.xlu0 %v2269_v54, %s2744_s17  ;;  %v2268_v22 = vperm.slane %v1940_v55, 0 }
 0x3ba   : > { %v2224_v50 = vmul.f32 0.5, %v2223_v43  ;;  %v3718_v59 = vadd.f32 1e-05, %v977_v5  ;;  %v3720_v0 = vadd.f32 1e-05, %v978_v53 }
 0x3bb   : > { %2624 = vrsqrt.f32 %v992_v4  ;;  %vm1014_vm12 = vweird.f32 %v992_v4 }
 0x3bc   : > { %v2225_v41 = vsub.f32 1.5, %v2224_v50  ;;  %2626 = vrsqrt.f32 %v3718_v59  ;;  %vm1024_vm14 = vweird.f32 %v3718_v59  ;;  %vm1034_vm8 = vweird.f32 %v3720_v0 }
 0x3bd   : > { %2628 = vrsqrt.f32 %v3720_v0 }
 0x3be   : > { %v2226_v18 = vmul.f32 %v2623_v31, %v2225_v41 }
 0x3bf   : > { %v939_v20 = vpop.xlane.xlu2 %938  ;;  %v954_v6 = vpop.xlane.xlu0 %953 }
 0x3c0   : > { %v2230_v38 = vsel %vm2229_vm11, %v2623_v31, %v2226_v18  ;;  %v979_v27 = vmul.f32 0.015625, %v939_v20  ;;  %v957_v10 = vpop.xlane.xlu1 %956  ;;  %v984_v24 = vmul.f32 0.015625, %v954_v6 }
 0x3c1   : > { %v2625_v7 = vpop.eup %2624  ;;  %2241 = vrot.lane.b32.xlu1 %v2230_v38, %s2744_s17  ;;  %v985_v12 = vmul.f32 0.015625, %v957_v10 }
 0x3c2   : > { %v1009_v35 = vmul.f32 %v2625_v7, %v992_v4  ;;  %v2627_v45 = vpop.eup %2626  ;;  %v3725_v61 = vadd.f32 1e-05, %v979_v27  ;;  %v3727_v9 = vadd.f32 1e-05, %v984_v24  ;;  %vm1015_vm13 = vweird.f32 %v2625_v7  ;;  %v3755_v4 = vld [vmem:[%s4521_s8] ss:$0 sm:$0xff] }
 0x3c3   : > { %v2629_v8 = vpop.eup %2628  ;;  %v1019_v3 = vmul.f32 %v2627_v45, %v3718_v59  ;;  %v3730_v16 = vadd.f32 1e-05, %v985_v12  ;;  %vm1025_vm15 = vweird.f32 %v2627_v45  ;;  %vm1016_vm9 = vmor %vm1014_vm12, %vm1015_vm13 }
 0x3c4   : > { %v1010_v23 = vmul.f32 %v2625_v7, %v1009_v35  ;;  %v1029_v49 = vmul.f32 %v2629_v8, %v3720_v0  ;;  %2630 = vrsqrt.f32 %v3725_v61  ;;  %vm1035_vm10 = vweird.f32 %v2629_v8  ;;  %vm1026_vm12 = vmor %vm1024_vm14, %vm1025_vm15 }
 0x3c5   : > { %v1020_v63 = vmul.f32 %v2627_v45, %v1019_v3  ;;  %2632 = vrsqrt.f32 %v3730_v16  ;;  %vm1044_vm11 = vweird.f32 %v3725_v61 }
 0x3c6   : > { %v1011_v46 = vmul.f32 0.5, %v1010_v23  ;;  %v1030_v28 = vmul.f32 %v2629_v8, %v1029_v49  ;;  %2634 = vrsqrt.f32 %v3727_v9 }
 0x3c7   : > { %v1021_v1 = vmul.f32 0.5, %v1020_v63  ;;  %v963_v30 = vpop.xlane.xlu2 %962  ;;  %v960_v37 = vpop.xlane.xlu0 %959 }
 0x3c8   : > { %v1012_v34 = vsub.f32 1.5, %v1011_v46  ;;  %v1031_v31 = vmul.f32 0.5, %v1030_v28  ;;  %v987_v36 = vmul.f32 0.015625, %v963_v30  ;;  %v942_v58 = vpop.xlane.xlu1 %941  ;;  %v986_v57 = vmul.f32 0.015625, %v960_v37 }
 0x3c9   : > { %2270 = vrot.lane.b32.xlu1 %v2268_v22, %s2744_s17  ;;  %v1022_v55 = vsub.f32 1.5, %v1021_v1  ;;  %v980_v54 = vmul.f32 0.015625, %v942_v58 }
 0x3ca   : > { %v1013_v21 = vmul.f32 %v2625_v7, %v1012_v34  ;;  %v2631_v43 = vpop.eup %2630  ;;  %v1032_v56 = vsub.f32 1.5, %v1031_v31  ;;  %v3746_v47 = vadd.f32 1e-05, %v987_v36  ;;  %v3750_v18 = vadd.f32 1e-05, %v986_v57 }
 0x3cb   : > { %v2633_v5 = vpop.eup %2632  ;;  %v1023_v50 = vmul.f32 %v2627_v45, %v1022_v55  ;;  %v1039_v41 = vmul.f32 %v2631_v43, %v3725_v61  ;;  %vm1045_vm13 = vweird.f32 %v2631_v43  ;;  %v3773_v34 = vadd.f32 1e-05, %v980_v54 }
 0x3cc   : > { %v1017_v53 = vsel %vm1016_vm9, %v2625_v7, %v1013_v21  ;;  %v2635_v20 = vpop.eup %2634  ;;  %v1033_v38 = vmul.f32 %v2629_v8, %v1032_v56  ;;  %v1099_v7 = vmul.f32 %v2633_v5, %v3730_v16  ;;  %vm1036_vm9 = vmor %vm1034_vm8, %vm1035_vm10  ;;  %vm1105_vm7 = vweird.f32 %v2633_v5 }
 0x3cd   : > { %v1168_v6 = vmul.f32 %v1017_v53, %v3611_v15  ;;  %v1027_v27 = vsel %vm1026_vm12, %v2627_v45, %v1023_v50  ;;  %v1040_v10 = vmul.f32 %v2631_v43, %v1039_v41  ;;  %v1089_v24 = vmul.f32 %v2635_v20, %v3727_v9  ;;  %vm1046_vm15 = vmor %vm1044_vm11, %vm1045_vm13 }
 0x3ce   : > { %v1169_v15 = vmul.f32 %v1027_v27, %v3614_v17  ;;  %v1037_v12 = vsel %vm1036_vm9, %v2629_v8, %v1033_v38  ;;  %v1100_v59 = vmul.f32 %v2633_v5, %v1099_v7  ;;  %2636 = vrsqrt.f32 %v3746_v47 }
 0x3cf   : > { %v1187_v35 = vmul.f32 %v3742_v14, %v1168_v6  ;;  %v1170_v23 = vmul.f32 %v1037_v12, %v3617_v19  ;;  %v1041_v3 = vmul.f32 0.5, %v1040_v10  ;;  %v1090_v49 = vmul.f32 %v2635_v20, %v1089_v24 }
 0x3d0   : > { %v1188_v0 = vmul.f32 %v3742_v14, %v1169_v15  ;;  %v1101_v22 = vmul.f32 0.5, %v1100_v59  ;;  %vm1095_vm14 = vweird.f32 %v2635_v20  ;;  %2638 = vrsqrt.f32 %v3750_v18 }
 0x3d1   : > { %v1206_v45 = vadd.f32 %v3755_v4, %v1187_v35  ;;  %v1189_v46 = vmul.f32 %v3742_v14, %v1170_v23  ;;  %v1042_v63 = vsub.f32 1.5, %v1041_v3  ;;  %v1091_v28 = vmul.f32 0.5, %v1090_v49  ;;  %v948_v23 = vpop.xlane.xlu2 %947 }
 0x3d2   : > { %v1207_v8 = vadd.f32 %v3755_v4, %v1188_v0  ;;  %v1102_v19 = vsub.f32 1.5, %v1101_v22  ;;  %2640 = vrsqrt.f32 %v3773_v34  ;;  %vm1104_vm8 = vweird.f32 %v3730_v16  ;;  %v966_v22 = vpop.xlane.xlu1 %965 }
 0x3d3   : > { %v2560_v17 = vmul.f32 -1.442695, %v1206_v45  ;;  %v1208_v1 = vadd.f32 %v3755_v4, %v1189_v46  ;;  %v1043_v30 = vmul.f32 %v2631_v43, %v1042_v63  ;;  %v1092_v37 = vsub.f32 1.5, %v1091_v28  ;;  %vm1106_vm10 = vmor %vm1104_vm8, %vm1105_vm7 }
 0x3d4   : > { %v2561_v31 = vmul.f32 -1.442695, %v1207_v8  ;;  %v1103_v36 = vmul.f32 %v2633_v5, %v1102_v19  ;;  %v2637_v58 = vpop.eup %2636  ;;  %vm1094_vm12 = vweird.f32 %v3727_v9  ;;  %vm1124_vm7 = vweird.f32 %v3746_v47 }
 0x3d5   : > { %2642 = vpow2.f32 %v2560_v17  ;;  %v2562_v57 = vmul.f32 -1.442695, %v1208_v1  ;;  %v1047_v21 = vsel %vm1046_vm15, %v2631_v43, %v1043_v30  ;;  %v1093_v55 = vmul.f32 %v2635_v20, %v1092_v37  ;;  %vm1096_vm9 = vmor %vm1094_vm12, %vm1095_vm14 }
 0x3d6   : > { %2644 = vpow2.f32 %v2561_v31  ;;  %v1171_v56 = vmul.f32 %v1047_v21, %v3632_v40  ;;  %v1107_v54 = vsel %vm1106_vm10, %v2633_v5, %v1103_v36  ;;  %v1119_v61 = vmul.f32 %v2637_v58, %v3746_v47  ;;  %v3789_v50 = vpop.eup %2638 }
 0x3d7   : > { %2646 = vpow2.f32 %v2562_v57  ;;  %v1177_v53 = vmul.f32 %v1107_v54, %v3629_v39  ;;  %v1097_v16 = vsel %vm1096_vm9, %v2635_v20, %v1093_v55  ;;  %v1109_v39 = vmul.f32 %v3789_v50, %v3750_v18 }
 0x3d8   : > { %v1190_v43 = vmul.f32 %v3742_v14, %v1171_v56  ;;  %v1176_v41 = vmul.f32 %v1097_v16, %v3635_v26  ;;  %v1120_v6 = vmul.f32 %v2637_v58, %v1119_v61  ;;  %v3793_v9 = vpop.eup %2640  ;;  %vm1125_vm11 = vweird.f32 %v2637_v58  ;;  %v3834_v16 = vpop.xlane.xlu0 %944 }
 0x3d9   : > { %v1196_v40 = vmul.f32 %v3742_v14, %v1177_v53  ;;  %v1049_v26 = vmul.f32 %v3793_v9, %v3773_v34  ;;  %v1110_v0 = vmul.f32 %v3789_v50, %v1109_v39  ;;  %vm1126_vm13 = vmor %vm1124_vm7, %vm1125_vm11  ;;  %v982_v17 = vmul.f32 0.015625, %v948_v23 }
 0x3da   : > { %v1209_v38 = vadd.f32 %v3755_v4, %v1190_v43  ;;  %v1195_v7 = vmul.f32 %v3742_v14, %v1176_v41  ;;  %v1121_v27 = vmul.f32 0.5, %v1120_v6  ;;  %v988_v8 = vmul.f32 0.015625, %v966_v22 }
 0x3db   : > { %v2643_v5 = vpop.eup %2642  ;;  %v1215_v10 = vadd.f32 %v3755_v4, %v1196_v40  ;;  %v1050_v28 = vmul.f32 %v3793_v9, %v1049_v26  ;;  %v1111_v37 = vmul.f32 0.5, %v1110_v0  ;;  %v3820_v36 = vadd.f32 1e-05, %v982_v17 }
 0x3dc   : > { %v3800_v20 = vadd.f32 1.0, %v2643_v5  ;;  %v2645_v24 = vpop.eup %2644  ;;  %v2563_v35 = vmul.f32 -1.442695, %v1209_v38  ;;  %v1214_v15 = vadd.f32 %v3755_v4, %v1195_v7  ;;  %v1122_v12 = vsub.f32 1.5, %v1121_v27 }
 0x3dd   : > { %v2647_v59 = vpop.eup %2646  ;;  %v3808_v3 = vadd.f32 1.0, %v2645_v24  ;;  %v2569_v45 = vmul.f32 -1.442695, %v1215_v10  ;;  %v1051_v30 = vmul.f32 0.5, %v1050_v28  ;;  %v3822_v55 = vadd.f32 1e-05, %v988_v8 }
 0x3de   : > { %2648 = vrcp.f32 %v3800_v20  ;;  %v3810_v49 = vadd.f32 1.0, %v2647_v59  ;;  %v2568_v46 = vmul.f32 -1.442695, %v1214_v15  ;;  %v1123_v63 = vmul.f32 %v2637_v58, %v1122_v12 }
 0x3df   : > { %2650 = vpow2.f32 %v2563_v35  ;;  %v1052_v21 = vsub.f32 1.5, %v1051_v30  ;;  %v1112_v54 = vsub.f32 1.5, %v1111_v37  ;;  %vm1055_vm14 = vweird.f32 %v3793_v9 }
 0x3e0   : > { %2652 = vrcp.f32 %v3808_v3  ;;  %v1127_v47 = vsel %vm1126_vm13, %v2637_v58, %v1123_v63  ;;  %vm1054_vm15 = vweird.f32 %v3773_v34  ;;  %v1297_v5 = vand.u32 2147483648, %v3800_v20 }
 0x3e1   : > { %2654 = vrcp.f32 %v3810_v49  ;;  %v1179_v19 = vmul.f32 %v1127_v47, %v3650_v60  ;;  %v1053_v53 = vmul.f32 %v3793_v9, %v1052_v21  ;;  %vm1115_vm8 = vweird.f32 %v3789_v50  ;;  %vm3846_vm10 = vmor %vm1054_vm15, %vm1055_vm14 }
 0x3e2   : > { %2656 = vpow2.f32 %v2569_v45  ;;  %v1113_v10 = vmul.f32 %v3789_v50, %v1112_v54  ;;  %v1295_v35 = vand.u32 2147483647, %v3800_v20  ;;  %vm1114_vm12 = vweird.f32 %v3750_v18 }
 0x3e3   : > { %2658 = vpow2.f32 %v2568_v46  ;;  %v1198_v31 = vmul.f32 %v3742_v14, %v1179_v19  ;;  %v1057_v26 = vsel %vm3846_vm10, %v3793_v9, %v1053_v53  ;;  %v3862_v59 = vor.u32 1.1754944e-38, %v1297_v5  ;;  %vm1116_vm9 = vmor %vm1114_vm12, %vm1115_vm8 }
 0x3e4   : > { %v3817_v1 = vpop.eup %2648  ;;  %2660 = vrsqrt.f32 %v3820_v36  ;;  %v1312_v23 = vand.u32 2147483648, %v3808_v3  ;;  %v1327_v45 = vand.u32 2147483648, %v3810_v49  ;;  %v1172_v0 = vmul.f32 %v1057_v26, %v3647_v33 }
 0x3e5   : > { %v2651_v57 = vpop.eup %2650  ;;  %v1287_v58 = vmul.f32 %v3817_v1, %v3800_v20  ;;  %v1217_v60 = vadd.f32 %v3755_v4, %v1198_v31  ;;  %2662 = vrsqrt.f32 %v3822_v55  ;;  %v1117_v22 = vsel %vm1116_vm9, %v3789_v50, %v1113_v10  ;;  %v969_v31 = vpop.xlane.xlu0 %968  ;;  %v2285_v10 = vld [vmem:[%s4524_s11] sm:$0x3] }
 0x3e6   : > { %v3824_v56 = vpop.eup %2652  ;;  %v3859_v12 = vadd.f32 1.0, %v2651_v57  ;;  %v1310_v46 = vand.u32 2147483647, %v3808_v3  ;;  %v1178_v28 = vmul.f32 %v1117_v22, %v3653_v62  ;;  %v1191_v19 = vmul.f32 %v3742_v14, %v1172_v0  ;;  %v972_v22 = vpop.xlane.xlu2 %971 }
 0x3e7   : > { %v3830_v61 = vpop.eup %2654  ;;  %v1302_v41 = vmul.f32 %v3824_v56, %v3808_v3  ;;  %v2571_v6 = vmul.f32 -1.442695, %v1217_v60  ;;  %v1288_v7 = vsub.f32 1.0, %v1287_v58  ;;  %v3884_v50 = vor.u32 1.1754944e-38, %v1312_v23 }
 0x3e8   : > { %v2657_v43 = vpop.eup %2656  ;;  %v1317_v34 = vmul.f32 %v3830_v61, %v3810_v49  ;;  %v1197_v37 = vmul.f32 %v3742_v14, %v1178_v28  ;;  %v3893_v21 = vor.u32 1.1754944e-38, %v1327_v45  ;;  %v1210_v58 = vadd.f32 %v3755_v4, %v1191_v19 }
 0x3e9   : > { %v2659_v40 = vpop.eup %2658  ;;  %v3840_v38 = vadd.f32 1.0, %v2657_v43  ;;  %2664 = vpow2.f32 %v2571_v6  ;;  %v1303_v15 = vsub.f32 1.0, %v1302_v41  ;;  %v1289_v9 = vmul.f32 %v3817_v1, %v1288_v7 }
 0x3ea   : > { %v3844_v27 = vadd.f32 1.0, %v2659_v40  ;;  %v3856_v24 = vpop.eup %2660  ;;  %v1318_v63 = vsub.f32 1.0, %v1317_v34  ;;  %vm1074_vm7 = vweird.f32 %v3820_v36  ;;  %v1216_v41 = vadd.f32 %v3755_v4, %v1197_v37 }
 0x3eb   : > { %2666 = vrcp.f32 %v3840_v38  ;;  %v3873_v18 = vpop.eup %2662  ;;  %v1069_v17 = vmul.f32 %v3856_v24, %v3820_v36  ;;  %v1304_v8 = vmul.f32 %v3824_v56, %v1303_v15  ;;  %v3891_v57 = vadd.f32 %v3817_v1, %v1289_v9  ;;  %v3920_v15 = vld [vmem:[%s4525_s12] sm:$0x3] }
 0x3ec   : > { %2668 = vrcp.f32 %v3844_v27  ;;  %v1129_v33 = vmul.f32 %v3873_v18, %v3822_v55  ;;  %v3900_v54 = vmul.f32 %v3830_v61, %v1318_v63  ;;  %v1432_v43 = vand.u32 2147483648, %v3840_v38 }
 0x3ed   : > { %2670 = vrcp.f32 %v3859_v12  ;;  %v1070_v62 = vmul.f32 %v3856_v24, %v1069_v17  ;;  %v3908_v40 = vadd.f32 %v3824_v56, %v1304_v8  ;;  %v2564_v5 = vmul.f32 -1.442695, %v1210_v58  ;;  %v951_v17 = vpop.xlane.xlu1 %950 }
 0x3ee   : > { %v1130_v39 = vmul.f32 %v3873_v18, %v1129_v33  ;;  %v2570_v34 = vmul.f32 -1.442695, %v1216_v41  ;;  %vm1075_vm11 = vweird.f32 %v3856_v24  ;;  %v981_v26 = vmul.f32 0.015625, %v3834_v16 }
 0x3ef   : > { %v2665_v47 = vpop.eup %2664  ;;  %v1071_v7 = vmul.f32 0.5, %v1070_v62  ;;  %v2288_v16 = vperm.slane %v2285_v10, 1  ;;  %vm1135_vm13 = vweird.f32 %v3873_v18  ;;  %v2302_v19 = vperm.slane %v3920_v15, 0  ;;  %vm1076_vm14 = vmor %vm1074_vm7, %vm1075_vm11 }
 0x3f0   : > { %v3886_v30 = vadd.f32 1.0, %v2665_v47  ;;  %v1131_v0 = vmul.f32 0.5, %v1130_v39  ;;  %v3928_v28 = vadd.f32 1e-05, %v981_v26  ;;  %v1415_v37 = vand.u32 2147483647, %v3844_v27 }
 0x3f1   : > { %v3897_v60 = vpop.eup %2666  ;;  %v1072_v9 = vsub.f32 1.5, %v1071_v7  ;;  %2291 = vrot.lane.b32.xlu1 %v2288_v16, %s2744_s17  ;;  %v990_v62 = vmul.f32 0.015625, %v972_v22  ;;  %vm1134_vm15 = vweird.f32 %v3822_v55  ;;  %2304 = vrot.lane.b32.xlu0 %v2302_v19, %s2744_s17  ;;  %v989_v55 = vmul.f32 0.015625, %v969_v31 }
 0x3f2   : > { %v3905_v6 = vpop.eup %2668  ;;  %2672 = vrcp.f32 %v3886_v30  ;;  %v1422_v45 = vmul.f32 %v3897_v60, %v3840_v38  ;;  %v1132_v8 = vsub.f32 1.5, %v1131_v0  ;;  %vm1136_vm8 = vmor %vm1134_vm15, %vm1135_vm13  ;;  %v2287_v16 = vperm.slane %v2285_v10, 0 }
 0x3f3   : > { %v3922_v23 = vpop.eup %2670  ;;  %2674 = vpow2.f32 %v2564_v5  ;;  %v1407_v63 = vmul.f32 %v3905_v6, %v3844_v27  ;;  %v1073_v47 = vmul.f32 %v3856_v24, %v1072_v9  ;;  %v983_v5 = vmul.f32 0.015625, %v951_v17  ;;  %v975_v9 = vpop.xlane.xlu0 %974 }
 0x3f4   : > { %2676 = vpow2.f32 %v2570_v34  ;;  %v1332_v33 = vmul.f32 %v3922_v23, %v3859_v12  ;;  %v1133_v41 = vmul.f32 %v3873_v18, %v1132_v8  ;;  %v1423_v39 = vsub.f32 1.0, %v1422_v45  ;;  %2289 = vrot.lane.b32.xlu2 %v2287_v16, %s2744_s17 }
 0x3f5   : > { %2678 = vrsqrt.f32 %v3928_v28  ;;  %v1077_v58 = vsel %vm1076_vm14, %v3856_v24, %v1073_v47  ;;  %v1408_v34 = vsub.f32 1.0, %v1407_v63  ;;  %v3951_v26 = vadd.f32 1e-05, %v990_v62 }
 0x3f6   : > { %v1174_v36 = vmul.f32 %v1077_v58, %v3668_v44  ;;  %v1137_v0 = vsel %vm1136_vm8, %v3873_v18, %v1133_v41  ;;  %v3954_v22 = vadd.f32 1e-05, %v983_v5  ;;  %vm1292_vm10 = vweird.f32 %v3817_v1 }
 0x3f7   : > { %v1180_v63 = vmul.f32 %v1137_v0, %v3665_v11  ;;  %2680 = vrsqrt.f32 %v3951_v26  ;;  %v1417_v47 = vand.u32 2147483648, %v3844_v27  ;;  %v991_v18 = vmul.f32 0.015625, %v975_v9 }
 0x3f8   : > { %v3946_v7 = vpop.eup %2672  ;;  %v1193_v44 = vmul.f32 %v3742_v14, %v1174_v36  ;;  %2682 = vrsqrt.f32 %v3954_v22  ;;  %vm1291_vm12 = vweird.f32 %v3800_v20  ;;  %v1333_v10 = vsub.f32 1.0, %v1332_v33 }
 0x3f9   : > { %v2675_v24 = vpop.eup %2674  ;;  %v1452_v19 = vmul.f32 %v3946_v7, %v3886_v30  ;;  %v1199_v62 = vmul.f32 %v3742_v14, %v1180_v63  ;;  %vm1307_vm9 = vweird.f32 %v3824_v56  ;;  %v1424_v58 = vmul.f32 %v3897_v60, %v1423_v39  ;;  %vm4037_vm15 = vmor %vm1291_vm12, %vm1292_vm10 }
 0x3fa   : > { %v2677_v17 = vpop.eup %2676  ;;  %v3957_v45 = vadd.f32 1.0, %v2675_v24  ;;  %v1212_v11 = vadd.f32 %v3755_v4, %v1193_v44  ;;  %v3978_v41 = vor.u32 1.1754944e-38, %v1432_v43  ;;  %v1409_v5 = vmul.f32 %v3905_v6, %v1408_v34 }
 0x3fb   : > { %v3963_v8 = vadd.f32 1.0, %v2677_v17  ;;  %v3967_v31 = vpop.eup %2678  ;;  %v1218_v36 = vadd.f32 %v3755_v4, %v1199_v62  ;;  %v3986_v9 = vadd.f32 1e-05, %v989_v55  ;;  %vm1306_vm7 = vweird.f32 %v3808_v3 }
 0x3fc   : > { %2684 = vrcp.f32 %v3957_v45  ;;  %v1059_v33 = vmul.f32 %v3967_v31, %v3928_v28  ;;  %v3989_v39 = vor.u32 1.1754944e-38, %v1417_v47  ;;  %v3992_v24 = vadd.f32 1e-05, %v991_v18  ;;  %vm4064_vm10 = vmor %vm1306_vm7, %vm1307_vm9 }
 0x3fd   : > { %2686 = vrcp.f32 %v3963_v8  ;;  %v2303_v0 = vperm.slane %v3920_v15, 1  ;;  %v3995_v16 = vpop.eup %2680  ;;  %vm3999_vm11 = vcmp.eq.f32.partialorder %v1295_v35, 8.507059e+37  ;;  %v4004_v55 = vmul.f32 %v3922_v23, %v1333_v10 }
 0x3fe   : > { %v1060_v43 = vmul.f32 %v3967_v31, %v1059_v33  ;;  %v1453_v17 = vsub.f32 1.0, %v1452_v19  ;;  %v2566_v44 = vmul.f32 -1.442695, %v1212_v11  ;;  %v2572_v63 = vmul.f32 -1.442695, %v1218_v36  ;;  %v4006_v47 = vpop.eup %2682 }
 0x3ff   : > { %v4009_v18 = vadd.f32 %v3897_v60, %v1424_v58  ;;  %v1149_v62 = vmul.f32 %v3995_v16, %v3951_v26  ;;  %2688 = vrsqrt.f32 %v3986_v9  ;;  %v4015_v35 = vadd.f32 %v3905_v6, %v1409_v5  ;;  %2306 = vrot.lane.b32.xlu2 %v2303_v0, %s2744_s17 }
 0x400   : > { %v1061_v15 = vmul.f32 0.5, %v1060_v43  ;;  %v1447_v10 = vand.u32 2147483648, %v3963_v8  ;;  %2690 = vpow2.f32 %v2572_v63  ;;  %v1079_v19 = vmul.f32 %v4006_v47, %v3954_v22 }
 0x401   : > { %vm1065_vm13 = vweird.f32 %v3967_v31  ;;  %v1150_v58 = vmul.f32 %v3995_v16, %v1149_v62  ;;  %2692 = vrsqrt.f32 %v3992_v24  ;;  %v4029_v5 = vmul.f32 %v3946_v7, %v1453_v17 }
 0x402   : > { %v4020_v11 = vpop.eup %2684  ;;  %v1062_v33 = vsub.f32 1.5, %v1061_v15  ;;  %2694 = vpow2.f32 %v2566_v44  ;;  %vm1064_vm14 = vweird.f32 %v3928_v28  ;;  %v1080_v43 = vmul.f32 %v4006_v47, %v1079_v19 }
 0x403   : > { %v4026_v36 = vpop.eup %2686  ;;  %v1151_v15 = vmul.f32 0.5, %v1150_v58  ;;  %vm1154_vm8 = vweird.f32 %v3951_v26  ;;  %vm1084_vm6 = vweird.f32 %v3954_v22  ;;  %v4044_v17 = vor.u32 1.1754944e-38, %v1447_v10  ;;  %vm1066_vm5 = vmor %vm1064_vm14, %vm1065_vm13 }
 0x404   : > { %v1063_v0 = vmul.f32 %v3967_v31, %v1062_v33  ;;  %vm1155_vm4 = vweird.f32 %v3995_v16  ;;  %v1081_v28 = vmul.f32 0.5, %v1080_v43  ;;  %v1294_v20 = vsel %vm4037_vm15, %v3817_v1, %v3891_v57 }
 0x405   : > { %v2689_v44 = vpop.eup %2688  ;;  %v4055_v62 = vmul.f32 %v4020_v11, %v3957_v45  ;;  %v1437_v10 = vmul.f32 %v4026_v36, %v3963_v8  ;;  %v1152_v33 = vsub.f32 1.5, %v1151_v15  ;;  %vm4070_vm12 = vcmp.eq.f32.partialorder %v1310_v46, 8.507059e+37  ;;  %vm1156_vm13 = vmor %vm1154_vm8, %vm1155_vm4 }
 0x406   : > { %v1067_v19 = vsel %vm1066_vm5, %v3967_v31, %v1063_v0  ;;  %v2691_v58 = vpop.eup %2690  ;;  %v1082_v63 = vsub.f32 1.5, %v1081_v28  ;;  %vm1085_vm5 = vweird.f32 %v4006_v47  ;;  %v1139_v31 = vmul.f32 %v2689_v44, %v3986_v9 }
 0x407   : > { %v1173_v57 = vmul.f32 %v1067_v19, %v3671_v32  ;;  %v4077_v0 = vpop.eup %2692  ;;  %vm1321_vm9 = vweird.f32 %v3810_v49  ;;  %v1153_v15 = vmul.f32 %v3995_v16, %v1152_v33  ;;  %vm1144_vm7 = vweird.f32 %v3986_v9 }
 0x408   : > { %v4085_v3 = vsel %vm3999_vm11, %v3862_v59, %v1294_v20  ;;  %v1309_v32 = vsel %vm4064_vm10, %v3824_v56, %v3908_v40  ;;  %v2695_v46 = vpop.eup %2694  ;;  %v1083_v19 = vmul.f32 %v4006_v47, %v1082_v63  ;;  %v1140_v33 = vmul.f32 %v2689_v44, %v1139_v31  ;;  %vm1086_vm11 = vmor %vm1084_vm6, %vm1085_vm5 }
 0x409   : > { %v1192_v28 = vmul.f32 %v3742_v14, %v1173_v57  ;;  %v1159_v59 = vmul.f32 %v4077_v0, %v3992_v24  ;;  %v1348_v34 = vsub.f32 1.0, %v4055_v62  ;;  %v1438_v20 = vsub.f32 1.0, %v1437_v10 }
 0x40a   : > { %v4100_v53 = vadd.f32 1.0, %v2691_v58  ;;  %v1157_v56 = vsel %vm1156_vm13, %v3995_v16, %v1153_v15  ;;  %vm1164_vm4 = vweird.f32 %v3992_v24  ;;  %v1087_v43 = vsel %vm1086_vm11, %v4006_v47, %v1083_v19 }
 0x40b   : > { %v1211_v40 = vadd.f32 %v3755_v4, %v1192_v28  ;;  %v1182_v26 = vmul.f32 %v1157_v56, %v3686_v29  ;;  %v1141_v57 = vmul.f32 0.5, %v1140_v33  ;;  %v4111_v62 = vadd.f32 1.0, %v2695_v46 }
 0x40c   : > { %v1175_v10 = vmul.f32 %v1087_v43, %v3683_v25  ;;  %v1160_v16 = vmul.f32 %v4077_v0, %v1159_v59  ;;  %v1320_v58 = vadd.f32 %v3830_v61, %v3900_v54  ;;  %vm1145_vm6 = vweird.f32 %v2689_v44 }
 0x40d   : > { %v2565_v22 = vmul.f32 -1.442695, %v1211_v40  ;;  %v1201_v63 = vmul.f32 %v3742_v14, %v1182_v26  ;;  %v1142_v31 = vsub.f32 1.5, %v1141_v57  ;;  %2696 = vrcp.f32 %v4100_v53  ;;  %vm1146_vm15 = vmor %vm1144_vm7, %vm1145_vm6 }
 0x40e   : > { %v1194_v29 = vmul.f32 %v3742_v14, %v1175_v10  ;;  %v1161_v47 = vmul.f32 0.5, %v1160_v16  ;;  %vm1322_vm14 = vweird.f32 %v3830_v61  ;;  %v1325_v46 = vand.u32 2147483647, %v3810_v49 }
 0x40f   : > { %2698 = vpow2.f32 %v2565_v22  ;;  %v1220_v25 = vadd.f32 %v3755_v4, %v1201_v63  ;;  %v1143_v15 = vmul.f32 %v2689_v44, %v1142_v31  ;;  %vm1165_vm8 = vweird.f32 %v4077_v0  ;;  %vm4138_vm10 = vmor %vm1321_vm9, %vm1322_vm14 }
 0x410   : > { %v1213_v54 = vadd.f32 %v3755_v4, %v1194_v29  ;;  %v1162_v28 = vsub.f32 1.5, %v1161_v47  ;;  %v4130_v19 = vsel %vm4070_vm12, %v3884_v50, %v1309_v32  ;;  %v4133_v33 = vmul.f32 %v4026_v36, %v1438_v20  ;;  %vm1166_vm12 = vmor %vm1164_vm4, %vm1165_vm8 }
 0x411   : > { %2700 = vrcp.f32 %v4111_v62  ;;  %v2574_v59 = vmul.f32 -1.442695, %v1220_v25  ;;  %v1147_v56 = vsel %vm1146_vm15, %v2689_v44, %v1143_v15  ;;  %v1324_v50 = vsel %vm4138_vm10, %v3830_v61, %v1320_v58 }
 0x412   : > { %v2567_v40 = vmul.f32 -1.442695, %v1213_v54  ;;  %v1181_v26 = vmul.f32 %v1147_v56, %v3689_v2  ;;  %v1163_v1 = vmul.f32 %v4077_v0, %v1162_v28  ;;  %vm4149_vm5 = vcmp.eq.f32.partialorder %v1325_v46, 8.507059e+37 }
 0x413   : > { %2702 = vpow2.f32 %v2574_v59  ;;  %v1335_v49 = vadd.f32 %v3922_v23, %v4004_v55  ;;  %v1349_v32 = vmul.f32 %v4020_v11, %v1348_v34  ;;  %v4156_v2 = vpop.eup %2696  ;;  %vm1337_vm9 = vweird.f32 %v3922_v23 }
 0x414   : > { %2704 = vpow2.f32 %v2567_v40  ;;  %v1200_v20 = vmul.f32 %v3742_v14, %v1181_v26  ;;  %v1167_v61 = vsel %vm1166_vm12, %v4077_v0, %v1163_v1  ;;  %v1340_v57 = vand.u32 2147483647, %v3859_v12 }
 0x415   : > { %v2699_v24 = vpop.eup %2698  ;;  %v1183_v43 = vmul.f32 %v1167_v61, %v3701_v13  ;;  %v1342_v10 = vand.u32 2147483648, %v3859_v12  ;;  %v1350_v55 = vadd.f32 %v4020_v11, %v1349_v32  ;;  %vm1352_vm7 = vweird.f32 %v4020_v11 }
 0x416   : > { %v4165_v16 = vadd.f32 1.0, %v2699_v24  ;;  %v1219_v34 = vadd.f32 %v3755_v4, %v1200_v20  ;;  %v1357_v58 = vand.u32 2147483648, %v3957_v45  ;;  %v4174_v22 = vmul.f32 %v4156_v2, %v4100_v53 }
 0x417   : > { %v4170_v0 = vpop.eup %2700  ;;  %v1202_v13 = vmul.f32 %v3742_v14, %v1183_v43  ;;  %v4180_v63 = vsel %vm4149_vm5, %v3893_v21, %v1324_v50  ;;  %vm1336_vm13 = vweird.f32 %v3859_v12  ;;  %vm1351_vm4 = vweird.f32 %v3957_v45  ;;  %v564_v21 = vld [vmem:[%s4211_s24 + $0x20] sm:$0xff] }
 0x418   : > { %2706 = vrcp.f32 %v4165_v16  ;;  %v2573_v31 = vmul.f32 -1.442695, %v1219_v34  ;;  %vm4186_vm11 = vmor %vm1336_vm13, %vm1337_vm9  ;;  %v1355_v14 = vand.u32 2147483647, %v3957_v45  ;;  %vm4196_vm6 = vcmp.eq.f32.partialorder %v1340_v57, 8.507059e+37  ;;  %v563_v34 = vld [vmem:[%s4211_s24 + $0x18] sm:$0xff] }
 0x419   : > { %v2703_v47 = vpop.eup %2702  ;;  %v1221_v25 = vadd.f32 %v3755_v4, %v1202_v13  ;;  %v1339_v12 = vsel %vm4186_vm11, %v3922_v23, %v1335_v49  ;;  %v1343_v15 = vor.u32 1.1754944e-38, %v1342_v10  ;;  %vm4202_vm14 = vmor %vm1351_vm4, %vm1352_vm7  ;;  %v1358_v45 = vor.u32 1.1754944e-38, %v1357_v58  ;;  %v561_v49 = vld [vmem:[%s4211_s24 + $0x8] sm:$0xff] }
 0x41a   : > { %v2705_v54 = vpop.eup %2704  ;;  %v4213_v4 = vadd.f32 1.0, %v2703_v47  ;;  %2708 = vpow2.f32 %v2573_v31  ;;  %v1354_v23 = vsel %vm4202_vm14, %v4020_v11, %v1350_v55  ;;  %v1370_v56 = vand.u32 2147483647, %v4165_v16  ;;  %v560_v11 = vld [vmem:[%s4211_s24] sm:$0xff]  ;;  %v562_v55 = vld [vmem:[%s4211_s24 + $0x10] sm:$0xff] }
 0x41b   : > { %v4218_v28 = vadd.f32 1.0, %v2705_v54  ;;  %v2575_v59 = vmul.f32 -1.442695, %v1221_v25  ;;  %v1372_v9 = vand.u32 2147483648, %v4165_v16  ;;  %v1468_v40 = vsub.f32 1.0, %v4174_v22 }
 0x41c   : > { %2710 = vrcp.f32 %v4213_v4  ;;  %vm1356_vm15 = vcmp.eq.f32.partialorder %v1355_v14, 8.507059e+37  ;;  %v1377_v26 = vmul.f32 %v4170_v0, %v4111_v62  ;;  %v1344_v1 = vsel %vm4196_vm6, %v1343_v15, %v1339_v12 }
 0x41d   : > { %2712 = vrcp.f32 %v4218_v28  ;;  %v1359_v50 = vsel %vm1356_vm15, %v1358_v45, %v1354_v23  ;;  %vm1366_vm8 = vweird.f32 %v4165_v16  ;;  %v1385_v20 = vand.u32 2147483647, %v4111_v62 }
 0x41e   : > { %v2707_v44 = vpop.eup %2706  ;;  %2714 = vpow2.f32 %v2575_v59  ;;  %v1378_v32 = vsub.f32 1.0, %v1377_v26  ;;  %v1387_v61 = vand.u32 2147483648, %v4111_v62  ;;  %vm4235_vm10 = vcmp.eq.f32.partialorder %v1370_v56, 8.507059e+37 }
 0x41f   : > { %v1362_v24 = vmul.f32 %v2707_v44, %v4165_v16  ;;  %v1373_v57 = vor.u32 1.1754944e-38, %v1372_v9  ;;  %vm1381_vm12 = vweird.f32 %v4111_v62  ;;  %vm1382_vm5 = vweird.f32 %v4170_v0 }
 0x420   : > { %v2709_v10 = vpop.eup %2708  ;;  %v1379_v58 = vmul.f32 %v4170_v0, %v1378_v32  ;;  %v1400_v13 = vand.u32 2147483647, %v4218_v28  ;;  %v1402_v31 = vand.u32 2147483648, %v4218_v28  ;;  %v1526_v29 = vmul.f32 %v4085_v3, %v560_v11  ;;  %vm4263_vm11 = vmor %vm1381_vm12, %vm1382_vm5 }
 0x421   : > { %v4247_v14 = vadd.f32 1.0, %v2709_v10  ;;  %v1363_v47 = vsub.f32 1.0, %v1362_v24  ;;  %vm1367_vm9 = vweird.f32 %v2707_v44  ;;  %v1527_v25 = vmul.f32 %v4130_v19, %v561_v49  ;;  %v565_v24 = vld [vmem:[%s4211_s24 + $0x28] sm:$0xff] }
 0x422   : > { %v4250_v12 = vpop.eup %2710  ;;  %v1380_v15 = vadd.f32 %v4170_v0, %v1379_v58  ;;  %vm4254_vm7 = vcmp.eq.f32.partialorder %v1385_v20, 8.507059e+37  ;;  %v1388_v54 = vor.u32 1.1754944e-38, %v1387_v61  ;;  %vm1396_vm13 = vweird.f32 %v4218_v28  ;;  %vm1368_vm14 = vmor %vm1366_vm8, %vm1367_vm9 }
 0x423   : > { %v1403_v23 = vor.u32 1.1754944e-38, %v1402_v31  ;;  %v2713_v3 = vpop.eup %2712  ;;  %v1364_v45 = vmul.f32 %v2707_v44, %v1363_v47  ;;  %v1528_v59 = vmul.f32 %v4180_v63, %v562_v55  ;;  %v1529_v56 = vmul.f32 %v1344_v1, %v563_v34  ;;  %v566_v34 = vld [vmem:[%s4211_s24 + $0x30] sm:$0xff] }
 0x424   : > { %v1542_v9 = vsel %vm592_vm0, %v1526_v29, 0.0  ;;  %v2715_v26 = vpop.eup %2714  ;;  %2716 = vrcp.f32 %v4247_v14  ;;  %v1384_v11 = vsel %vm4263_vm11, %v4170_v0, %v1380_v15  ;;  %v1392_v62 = vmul.f32 %v2713_v3, %v4218_v28 }
 0x425   : > { %vm4274_vm4 = vcmp.eq.f32.partialorder %v1400_v13, 8.507059e+37  ;;  %v1543_v32 = vrot.slane %v1542_v9, 4  ;;  %v1365_v20 = vadd.f32 %v2707_v44, %v1364_v45  ;;  %vm1397_vm6 = vweird.f32 %v2713_v3 }
 0x426   : > { %v1530_v63 = vmul.f32 %v1359_v50, %v564_v21  ;;  %v1549_v1 = vsel %vm592_vm0, %v1527_v25, 0.0  ;;  %v4279_v61 = vadd.f32 1.0, %v2715_v26  ;;  %v1393_v0 = vsub.f32 1.0, %v1392_v62 }
 0x427   : > { %v1544_v10 = vadd.f32 %v1543_v32, %v1542_v9  ;;  %v1550_v55 = vrot.slane %v1549_v1, 4  ;;  %v1369_v58 = vsel %vm1368_vm14, %v2707_v44, %v1365_v20  ;;  %v1389_v13 = vsel %vm4254_vm7, %v1388_v54, %v1384_v11 }
 0x428   : > { %v1556_v31 = vsel %vm592_vm0, %v1528_v59, 0.0  ;;  %v1563_v50 = vsel %vm592_vm0, %v1529_v56, 0.0  ;;  %vm1412_vm15 = vweird.f32 %v3905_v6  ;;  %v1374_v29 = vsel %vm4235_vm10, %v1373_v57, %v1369_v58  ;;  %v567_v56 = vld [vmem:[%s4211_s24 + $0x38] sm:$0xff]  ;;  %vm1398_vm10 = vmor %vm1396_vm13, %vm1397_vm6 }
 0x429   : > { %v1394_v16 = vmul.f32 %v2713_v3, %v1393_v0  ;;  %v1545_v47 = vrot.slane %v1544_v10, 2  ;;  %v1551_v25 = vadd.f32 %v1550_v55, %v1549_v1  ;;  %v1531_v21 = vmul.f32 %v1374_v29, %v565_v24 }
 0x42a   : > { %v1557_v15 = vrot.slane %v1556_v31, 4  ;;  %v1564_v45 = vrot.slane %v1563_v50, 4  ;;  %v1570_v44 = vsel %vm592_vm0, %v1530_v63, 0.0  ;;  %v4294_v46 = vpop.eup %2716  ;;  %vm1427_vm8 = vweird.f32 %v3897_v60 }
 0x42b   : > { %vm1411_vm12 = vweird.f32 %v3844_v27  ;;  %v1395_v54 = vadd.f32 %v2713_v3, %v1394_v16  ;;  %v1532_v19 = vmul.f32 %v1389_v13, %v566_v34  ;;  %v1546_v59 = vadd.f32 %v1545_v47, %v1544_v10 }
 0x42c   : > { %v1552_v43 = vrot.slane %v1551_v25, 2  ;;  %v1558_v57 = vadd.f32 %v1557_v15, %v1556_v31  ;;  %v1565_v9 = vadd.f32 %v1564_v45, %v1563_v50  ;;  %v1571_v26 = vrot.slane %v1570_v44, 4  ;;  %vm1413_vm11 = vmor %vm1411_vm12, %vm1412_vm15 }
 0x42d   : > { %v1577_v11 = vsel %vm592_vm0, %v1531_v21, 0.0  ;;  %vm1426_vm5 = vweird.f32 %v3840_v38  ;;  %vm4306_vm9 = vcmp.eq.f32.partialorder %v1415_v37, 8.507059e+37  ;;  %v1399_v32 = vsel %vm1398_vm10, %v2713_v3, %v1395_v54 }
 0x42e   : > { %v1547_v20 = vrot.slane %v1546_v59, 1  ;;  %v1553_v63 = vadd.f32 %v1552_v43, %v1551_v25  ;;  %v1578_v1 = vrot.slane %v1577_v11, 4  ;;  %v1404_v28 = vsel %vm4274_vm4, %v1403_v23, %v1399_v32  ;;  %vm1428_vm4 = vmor %vm1426_vm5, %vm1427_vm8 }
 0x42f   : > { %v1559_v24 = vrot.slane %v1558_v57, 2  ;;  %v1566_v0 = vrot.slane %v1565_v9, 2  ;;  %v1572_v10 = vadd.f32 %v1571_v26, %v1570_v44  ;;  %v4565_v55 = vand.u32 2147483647, %v3840_v38 }
 0x430   : > { %v1533_v37 = vmul.f32 %v1404_v28, %v567_v56  ;;  %v1548_v58 = vadd.f32 %v1547_v20, %v1546_v59  ;;  %v1554_v13 = vrot.slane %v1553_v63, 1  ;;  %v1579_v31 = vadd.f32 %v1578_v1, %v1577_v11 }
 0x431   : > { %vm4314_vm7 = vcmp.eq.f32.partialorder %v4565_v55, 8.507059e+37  ;;  %v1560_v3 = vadd.f32 %v1559_v24, %v1558_v57  ;;  %v1567_v50 = vadd.f32 %v1566_v0, %v1565_v9  ;;  %v1573_v29 = vrot.slane %v1572_v10, 2 }
 0x432   : > { %v1584_v16 = vsel %vm592_vm0, %v1532_v19, 0.0  ;;  %vm1441_vm13 = vweird.f32 %v3963_v8  ;;  %v1555_v23 = vadd.f32 %v1554_v13, %v1553_v63  ;;  %v1580_v49 = vrot.slane %v1579_v31, 2 }
 0x433   : > { %v1585_v47 = vrot.slane %v1584_v16, 4  ;;  %v1591_v25 = vsel %vm592_vm0, %v1533_v37, 0.0  ;;  %v1561_v21 = vrot.slane %v1560_v3, 1  ;;  %v1568_v15 = vrot.slane %v1567_v50, 1 }
 0x434   : > { %v1574_v45 = vadd.f32 %v1573_v29, %v1572_v10  ;;  %v1592_v44 = vrot.slane %v1591_v25, 4  ;;  %2718 = vrcp.f32 %v4279_v61  ;;  %v1581_v54 = vadd.f32 %v1580_v49, %v1579_v31 }
 0x435   : > { %v1586_v59 = vadd.f32 %v1585_v47, %v1584_v16  ;;  %v2333_v43 = vsel %vm1798_vm1, %v1555_v23, %v1548_v58  ;;  %v1562_v19 = vadd.f32 %v1561_v21, %v1560_v3  ;;  %v1569_v56 = vadd.f32 %v1568_v15, %v1567_v50 }
 0x436   : > { %v1575_v57 = vrot.slane %v1574_v45, 1  ;;  %v1593_v9 = vadd.f32 %v1592_v44, %v1591_v25  ;;  %v1482_v26 = vmul.f32 %v4294_v46, %v4247_v14  ;;  %v1582_v11 = vrot.slane %v1581_v54, 1 }
 0x437   : > { %v1587_v32 = vrot.slane %v1586_v59, 2  ;;  %v1414_v20 = vsel %vm1413_vm11, %v3905_v6, %v4015_v35  ;;  %v2334_v1 = vsel %vm1800_vm2, %v1562_v19, %v2333_v43  ;;  %v1429_v6 = vsel %vm1428_vm4, %v3897_v60, %v4009_v18  ;;  %v568_v43 = vld [vmem:[%s4211_s24 + $0x40] sm:$0xff]  ;;  %v569_v19 = vld [vmem:[%s4211_s24 + $0x48] sm:$0xff] }
 0x438   : > { %v1576_v63 = vadd.f32 %v1575_v57, %v1574_v45  ;;  %v1594_v27 = vrot.slane %v1593_v9, 2  ;;  %v4339_v28 = vsel %vm4306_vm9, %v3989_v39, %v1414_v20  ;;  %v1583_v24 = vadd.f32 %v1582_v11, %v1581_v54  ;;  %v571_v11 = vld [vmem:[%s4211_s24 + $0x58] sm:$0xff] }
 0x439   : > { %v1588_v0 = vadd.f32 %v1587_v32, %v1586_v59  ;;  %v2335_v10 = vsel %vm1802_vm3, %v1569_v56, %v2334_v1  ;;  %vm4568_vm6 = vcmask 1044484   ;;  %v4348_v55 = vsel %vm4314_vm7, %v3978_v41, %v1429_v6 }
 0x43a   : > { %v1595_v35 = vadd.f32 %v1594_v27, %v1593_v9  ;;  %v2336_v38 = vsel %vm4568_vm6, %v1576_v63, %v2335_v10  ;;  %v1440_v62 = vadd.f32 %v4026_v36, %v4133_v33  ;;  %v4352_v39 = vpop.eup %2718  ;;  %vm4569_vm14 = vcmask 1045509   ;;  %v572_v63 = vld [vmem:[%s4211_s24 + $0x60] sm:$0xff]  ;;  %v573_v27 = vld [vmem:[%s4211_s24 + $0x68] sm:$0xff] }
 0x43b   : > { %v1589_v37 = vrot.slane %v1588_v0, 1  ;;  %v2337_v58 = vsel %vm4569_vm14, %v1583_v24, %v2336_v38  ;;  %vm1442_vm15 = vweird.f32 %v4026_v36  ;;  %v1445_v60 = vand.u32 2147483647, %v3963_v8 }
 0x43c   : > { %v1596_v18 = vrot.slane %v1595_v35, 1  ;;  %vm1443_vm8 = vmor %vm1441_vm13, %vm1442_vm15  ;;  %v1455_v41 = vadd.f32 %v3946_v7, %v4029_v5  ;;  %vm1456_vm12 = vweird.f32 %v3886_v30  ;;  %vm1457_vm10 = vweird.f32 %v3946_v7 }
 0x43d   : > { %v1590_v33 = vadd.f32 %v1589_v37, %v1588_v0  ;;  %v1444_v34 = vsel %vm1443_vm8, %v4026_v36, %v1440_v62  ;;  %vm1446_vm5 = vcmp.eq.f32.partialorder %v1445_v60, 8.507059e+37  ;;  %vm4364_vm9 = vmor %vm1456_vm12, %vm1457_vm10  ;;  %v1460_v31 = vand.u32 2147483647, %v3886_v30 }
 0x43e   : > { %v1597_v3 = vadd.f32 %v1596_v18, %v1595_v35  ;;  %v1449_v8 = vsel %vm1446_vm5, %v4044_v17, %v1444_v34  ;;  %v1459_v5 = vsel %vm4364_vm9, %v3946_v7, %v1455_v41  ;;  %v1462_v50 = vand.u32 2147483648, %v3886_v30  ;;  %v574_v18 = vld [vmem:[%s4211_s24 + $0x70] sm:$0xff] }
 0x43f   : > { %vm4572_vm7 = vcmask 1046534   ;;  %vm1461_vm13 = vcmp.eq.f32.partialorder %v1460_v31, 8.507059e+37  ;;  %v1469_v36 = vmul.f32 %v4156_v2, %v1468_v40  ;;  %vm1471_vm11 = vweird.f32 %v4100_v53 }
 0x440   : > { %v2338_v29 = vsel %vm4572_vm7, %v1590_v33, %v2337_v58  ;;  %vm4573_vm4 = vcmask 1047559   ;;  %v1463_v23 = vor.u32 1.1754944e-38, %v1462_v50  ;;  %vm1472_vm6 = vweird.f32 %v4156_v2 }
 0x441   : > { %v2339_v16 = vsel %vm4573_vm4, %v1597_v3, %v2338_v29  ;;  %v1475_v17 = vand.u32 2147483647, %v4100_v53  ;;  %v1470_v30 = vadd.f32 %v4156_v2, %v1469_v36  ;;  %v1477_v7 = vand.u32 2147483648, %v4100_v53  ;;  %vm1473_vm15 = vmor %vm1471_vm11, %vm1472_vm6 }
 0x442   : > { %2347 = vrot.lane.b32.xlu1 %v2339_v16, %s2744_s17  ;;  %v1483_v49 = vsub.f32 1.0, %v1482_v26  ;;  %vm1486_vm14 = vweird.f32 %v4247_v14  ;;  %v1464_v22 = vsel %vm1461_vm13, %v1463_v23, %v1459_v5  ;;  %vm1487_vm12 = vweird.f32 %v4294_v46  ;;  %v570_v26 = vld [vmem:[%s4211_s24 + $0x50] sm:$0xff] }
 0x443   : > { %vm1476_vm8 = vcmp.eq.f32.partialorder %v1475_v17, 8.507059e+37  ;;  %v1490_v40 = vand.u32 2147483647, %v4247_v14  ;;  %v1474_v47 = vsel %vm1473_vm15, %v4156_v2, %v1470_v30  ;;  %v1478_v25 = vor.u32 1.1754944e-38, %v1477_v7  ;;  %vm1488_vm7 = vmor %vm1486_vm14, %vm1487_vm12 }
 0x444   : > { %v1484_v21 = vmul.f32 %v4294_v46, %v1483_v49  ;;  %v1492_v15 = vand.u32 2147483648, %v4247_v14  ;;  %v1497_v45 = vmul.f32 %v4250_v12, %v4213_v4  ;;  %vm1501_vm5 = vweird.f32 %v4213_v4 }
 0x445   : > { %vm4391_vm10 = vcmp.eq.f32.partialorder %v1490_v40, 8.507059e+37  ;;  %vm1502_vm9 = vweird.f32 %v4250_v12  ;;  %v1479_v44 = vsel %vm1476_vm8, %v1478_v25, %v1474_v47  ;;  %v1505_v59 = vand.u32 2147483647, %v4213_v4 }
 0x446   : > { %v1485_v2 = vadd.f32 %v4294_v46, %v1484_v21  ;;  %v1493_v54 = vor.u32 1.1754944e-38, %v1492_v15  ;;  %v1498_v56 = vsub.f32 1.0, %v1497_v45  ;;  %v1507_v57 = vand.u32 2147483648, %v4213_v4  ;;  %vm1503_vm14 = vmor %vm1501_vm5, %vm1502_vm9 }
 0x447   : > { %v1512_v9 = vmul.f32 %v4352_v39, %v4279_v61  ;;  %vm1516_vm13 = vweird.f32 %v4279_v61  ;;  %vm4414_vm11 = vcmp.eq.f32.partialorder %v1505_v59, 8.507059e+37  ;;  %vm1517_vm4 = vweird.f32 %v4352_v39 }
 0x448   : > { %v1489_v32 = vsel %vm1488_vm7, %v4294_v46, %v1485_v2  ;;  %v1520_v14 = vand.u32 2147483647, %v4279_v61  ;;  %v1499_v24 = vmul.f32 %v4250_v12, %v1498_v56  ;;  %v1508_v0 = vor.u32 1.1754944e-38, %v1507_v57  ;;  %vm1518_vm15 = vmor %vm1516_vm13, %vm1517_vm4 }
 0x449   : > { %v1494_v1 = vsel %vm4391_vm10, %v1493_v54, %v1489_v32  ;;  %v1513_v10 = vsub.f32 1.0, %v1512_v9  ;;  %v1522_v6 = vand.u32 2147483648, %v4279_v61  ;;  %v1534_v35 = vmul.f32 %v4339_v28, %v568_v43 }
 0x44a   : > { %vm4425_vm6 = vcmp.eq.f32.partialorder %v1520_v14, 8.507059e+37  ;;  %v1535_v38 = vmul.f32 %v4348_v55, %v569_v19  ;;  %v1500_v62 = vadd.f32 %v4250_v12, %v1499_v24  ;;  %v1536_v58 = vmul.f32 %v1449_v8, %v570_v26  ;;  %v575_v8 = vld [vmem:[%s4211_s24 + $0x78] sm:$0xff] }
 0x44b   : > { %v1514_v37 = vmul.f32 %v4352_v39, %v1513_v10  ;;  %v1537_v60 = vmul.f32 %v1464_v22, %v571_v11  ;;  %v1523_v41 = vor.u32 1.1754944e-38, %v1522_v6  ;;  %v1538_v33 = vmul.f32 %v1479_v44, %v572_v63 }
 0x44c   : > { %v1539_v34 = vmul.f32 %v1494_v1, %v573_v27  ;;  %v1598_v28 = vsel %vm592_vm0, %v1534_v35, 0.0  ;;  %v1504_v13 = vsel %vm1503_vm14, %v4250_v12, %v1500_v62  ;;  %v1605_v3 = vsel %vm592_vm0, %v1535_v38, 0.0 }
 0x44d   : > { %v1515_v55 = vadd.f32 %v4352_v39, %v1514_v37  ;;  %v1599_v31 = vrot.slane %v1598_v28, 4  ;;  %v1509_v5 = vsel %vm4414_vm11, %v1508_v0, %v1504_v13  ;;  %v1606_v4 = vrot.slane %v1605_v3, 4 }
 0x44e   : > { %v1612_v50 = vsel %vm592_vm0, %v1536_v58, 0.0  ;;  %v1619_v29 = vsel %vm592_vm0, %v1537_v60, 0.0  ;;  %v1540_v36 = vmul.f32 %v1509_v5, %v574_v18  ;;  %v1626_v49 = vsel %vm592_vm0, %v1538_v33, 0.0 }
 0x44f   : > { %v1519_v12 = vsel %vm1518_vm15, %v4352_v39, %v1515_v55  ;;  %v1600_v16 = vadd.f32 %v1599_v31, %v1598_v28  ;;  %v1613_v23 = vrot.slane %v1612_v50, 4  ;;  %v1607_v30 = vadd.f32 %v1606_v4, %v1605_v3 }
 0x450   : > { %v1524_v17 = vsel %vm4425_vm6, %v1523_v41, %v1519_v12  ;;  %v1620_v7 = vrot.slane %v1619_v29, 4  ;;  %v1627_v47 = vrot.slane %v1626_v49, 4  ;;  %v1633_v15 = vsel %vm592_vm0, %v1539_v34, 0.0 }
 0x451   : > { %v1541_v22 = vmul.f32 %v1524_v17, %v575_v8  ;;  %v1601_v61 = vrot.slane %v1600_v16, 2  ;;  %v1614_v40 = vadd.f32 %v1613_v23, %v1612_v50  ;;  %v1608_v25 = vrot.slane %v1607_v30, 2  ;;  %v2259_v23 = vpop.permute.xlu2 %2258 }
 0x452   : > { %v1621_v21 = vadd.f32 %v1620_v7, %v1619_v29  ;;  %v1640_v39 = vsel %vm592_vm0, %v1540_v36, 0.0  ;;  %v1628_v44 = vadd.f32 %v1627_v47, %v1626_v49  ;;  %v1634_v2 = vrot.slane %v1633_v15, 4  ;;  %v2236_v36 = vpop.permute.xlu1 %2235 }
 0x453   : > { %v1602_v53 = vadd.f32 %v1601_v61, %v1600_v16  ;;  %v1615_v45 = vrot.slane %v1614_v40, 2  ;;  %v1609_v54 = vadd.f32 %v1608_v25, %v1607_v30  ;;  %v1641_v43 = vrot.slane %v1640_v39, 4  ;;  %v2257_v16 = vpop.permute.xlu0 %2256 }
 0x454   : > { %v1622_v59 = vrot.slane %v1621_v21, 2  ;;  %v1647_v19 = vsel %vm592_vm0, %v1541_v22, 0.0  ;;  %v1629_v9 = vrot.slane %v1628_v44, 2  ;;  %v1635_v26 = vadd.f32 %v1634_v2, %v1633_v15 }
 0x455   : > { %v1603_v56 = vrot.slane %v1602_v53, 1  ;;  %v1616_v57 = vadd.f32 %v1615_v45, %v1614_v40  ;;  %v1610_v11 = vrot.slane %v1609_v54, 1  ;;  %v1642_v20 = vadd.f32 %v1641_v43, %v1640_v39 }
 0x456   : > { %v1623_v32 = vadd.f32 %v1622_v59, %v1621_v21  ;;  %v1648_v14 = vrot.slane %v1647_v19, 4  ;;  %v1630_v1 = vadd.f32 %v1629_v9, %v1628_v44  ;;  %v1636_v24 = vrot.slane %v1635_v26, 2 }
 0x457   : > { %v1604_v63 = vadd.f32 %v1603_v56, %v1602_v53  ;;  %v1617_v27 = vrot.slane %v1616_v57, 1  ;;  %v1611_v0 = vadd.f32 %v1610_v11, %v1609_v54  ;;  %v1643_v46 = vrot.slane %v1642_v20, 2 }
 0x458   : > { %v1624_v10 = vrot.slane %v1623_v32, 1  ;;  %v1649_v6 = vadd.f32 %v1648_v14, %v1647_v19  ;;  %v1631_v38 = vrot.slane %v1630_v1, 1  ;;  %v1637_v62 = vadd.f32 %v1636_v24, %v1635_v26 }
 0x459   : > { %v1618_v35 = vadd.f32 %v1617_v27, %v1616_v57  ;;  %v1644_v58 = vadd.f32 %v1643_v46, %v1642_v20  ;;  %v2340_v18 = vsel %vm1798_vm1, %v1611_v0, %v1604_v63  ;;  %vm4580_vm8 = vcmask 1044484   ;;  %v2238_v7 = vpop.permute.xlu2 %2237 }
 0x45a   : > { %v1625_v37 = vadd.f32 %v1624_v10, %v1623_v32  ;;  %v1650_v60 = vrot.slane %v1649_v6, 2  ;;  %v1632_v41 = vadd.f32 %v1631_v38, %v1630_v1  ;;  %v1638_v33 = vrot.slane %v1637_v62, 1  ;;  %v2242_v17 = vpop.permute.xlu1 %2241 }
 0x45b   : > { %v2341_v34 = vsel %vm1800_vm2, %v1618_v35, %v2340_v18  ;;  %v1645_v28 = vrot.slane %v1644_v58, 1  ;;  %vm4581_vm12 = vcmask 1045509   ;;  %vm4582_vm10 = vcmask 1046534   ;;  %v2240_v30 = vpop.permute.xlu0 %2239 }
 0x45c   : > { %v1651_v13 = vadd.f32 %v1650_v60, %v1649_v6  ;;  %v1639_v55 = vadd.f32 %v1638_v33, %v1637_v62  ;;  %v2342_v31 = vsel %vm1802_vm3, %v1625_v37, %v2341_v34  ;;  %vm4583_vm5 = vcmask 1047559  }
 0x45d   : > { %v1646_v3 = vadd.f32 %v1645_v28, %v1644_v58  ;;  %v2343_v5 = vsel %vm4580_vm8, %v1632_v41, %v2342_v31  ;;  %v2243_v49 = vsel %vm592_vm0, %v2236_v36, %v2238_v7  ;;  %v2249_v22 = vmul.f32 %v2236_v36, %v3496_v42 }
 0x45e   : > { %v1652_v8 = vrot.slane %v1651_v13, 1  ;;  %v2344_v4 = vsel %vm4581_vm12, %v1639_v55, %v2343_v5  ;;  %v2250_v61 = vmul.f32 %v2243_v49, %v3500_v48  ;;  %v2260_v25 = vsel %vm592_vm0, %v2257_v16, %v2259_v23 }
 0x45f   : > { %v2345_v29 = vsel %vm4582_vm10, %v1646_v3, %v2344_v4  ;;  %v2263_v21 = vmul.f32 %v2257_v16, %v2249_v22  ;;  %v2244_v14 = vsel %vm592_vm0, %v2240_v30, %v2242_v17  ;;  %v2251_v63 = vmul.f32 %v2240_v30, %v3504_v51 }
 0x460   : > { %v1653_v50 = vadd.f32 %v1652_v8, %v1651_v13  ;;  %v2264_v39 = vmul.f32 %v2260_v25, %v2250_v61  ;;  %v2252_v27 = vmul.f32 %v2244_v14, %v3507_v52 }
 0x461   : > { %v2290_v44 = vpop.permute.xlu2 %2289  ;;  %v2265_v1 = vmul.f32 %v2257_v16, %v2251_v63  ;;  %v2615_v16 = vld [vmem:[%s4527_s14] ss:$0 sm:$0xff] }
 0x462   : > { %v2346_v12 = vsel %vm4583_vm5, %v1653_v50, %v2345_v29  ;;  %v2271_v40 = vpop.permute.xlu1 %2270  ;;  %v2266_v24 = vmul.f32 %v2260_v25, %v2252_v27  ;;  %v2614_v29 = vld [vmem:[%s4526_s13] ss:$0 sm:$0xff] }
 0x463   : > { %2349 = vrot.lane.b32.xlu0 %v2346_v12, %s2744_s17  ;;  %v2273_v47 = vpop.permute.xlu0 %2272  ;;  %v2277_v53 = vadd.f32 %v2271_v40, %v2263_v21  ;;  %v2279_v0 = vadd.f32 %v2271_v40, %v2265_v1 }
 0x464   : > { %v2274_v15 = vsel %vm592_vm0, %v2271_v40, %v2273_v47 }
 0x465   : > { %v2278_v45 = vadd.f32 %v2274_v15, %v2264_v39  ;;  %2720 = vtanh.f32 %v2277_v53  ;;  %v2280_v10 = vadd.f32 %v2274_v15, %v2266_v24 }
 0x467   : > { %2722 = vtanh.f32 %v2278_v45 }
 0x468   : > { %2724 = vtanh.f32 %v2279_v0 }
 0x469   : > { %v2307_v43 = vpop.permute.xlu2 %2306  ;;  %2726 = vtanh.f32 %v2280_v10 }
 0x46a   : > { %v2292_v2 = vpop.permute.xlu1 %2291 }
 0x46b   : > { %v2721_v54 = vpop.eup %2720  ;;  %v2293_v42 = vsel %vm592_vm0, %v2290_v44, %v2292_v2  ;;  %v2305_v48 = vpop.permute.xlu0 %2304 }
 0x46c   : > { %v2296_v19 = vmul.f32 %v2721_v54, %v2290_v44  ;;  %v2308_v57 = vsel %vm592_vm0, %v2305_v48, %v2307_v43 }
 0x46d   : > { %v2723_v59 = vpop.eup %2722 }
 0x46e   : > { %v2297_v56 = vmul.f32 %v2723_v59, %v2293_v42  ;;  %v2311_v9 = vadd.f32 %v2305_v48, %v2296_v19  ;;  %v2725_v46 = vpop.eup %2724 }
 0x46f   : > { %v2727_v6 = vpop.eup %2726  ;;  %v2298_v35 = vmul.f32 %v2725_v46, %v2290_v44 }
 0x470   : > { %v4474_v26 = vadd.f32 %v2308_v57, %v2297_v56  ;;  %v2299_v38 = vmul.f32 %v2727_v6, %v2293_v42 }
 0x471   : > { %v2313_v62 = vadd.f32 %v2305_v48, %v2298_v35 }
 0x472   : > { %v2315_v11 = vmul.f32 %v4474_v26, %v2311_v9  ;;  %v4481_v37 = vadd.f32 %v2308_v57, %v2299_v38 }
 0x474   : > { %v2316_v58 = vmul.f32 %v4481_v37, %v2313_v62 }
 0x4b4   : > { %v2348_v32 = vpop.permute.xlu1 %2347 }
 0x4b5   : > { %v2353_v20 = vadd.f32 %v2348_v32, %v2315_v11 }
 0x4b7   : > { %2359 = vrot.lane.b32.xlu2 %v2353_v20, %s2744_s17 }
 0x4d5   : > { %v2350_v60 = vpop.permute.xlu0 %2349 }
 0x4d6   : > { %v2354_v18 = vadd.f32 %v2350_v60, %v2316_v58 }
 0x4d8   : > { %2361 = vrot.lane.b32.xlu1 %v2354_v18, %s2744_s17 }
 0x511   : > { %v2360_v51 = vpop.permute.xlu2 %2359 }
 0x512   : > { %v2365_v52 = vsel %vm592_vm0, %v2360_v51, 0.0 }
 0x513   : > { %2366 = vadd.xlane.f32.xlu0 %v2365_v52 }
 0x54a   : > { %v2362_v41 = vpop.permute.xlu1 %2361 }
 0x54b   : > { %v2368_v33 = vsel %vm592_vm0, %v2362_v41, 0.0 }
 0x54c   : > { %2369 = vadd.xlane.f32.xlu2 %v2368_v33 }
 0x564   : > { %2419 = vrot.lane.b32.xlu2 %v2614_v29, %s2744_s17 }
 0x586   : > { %v2367_v34 = vpop.xlane.xlu0 %2366 }
 0x587   : > { %v2371_v28 = vmul.f32 0.015625, %v2367_v34 }
 0x589   : > { %v2373_v13 = vsub.f32 %v2353_v20, %v2371_v28 }
 0x58b   : > { %v2375_v55 = vmul.f32 %v2373_v13, %v2373_v13 }
 0x58d   : > { %2379 = vrot.lane.b32.xlu1 %v2375_v55, %s2744_s17 }
 0x5bf   : > { %v2370_v31 = vpop.xlane.xlu2 %2369 }
 0x5c0   : > { %v2372_v3 = vmul.f32 0.015625, %v2370_v31 }
 0x5c2   : > { %v2374_v8 = vsub.f32 %v2354_v18, %v2372_v3 }
 0x5c4   : > { %v2376_v5 = vmul.f32 %v2374_v8, %v2374_v8 }
 0x5c6   : > { %2381 = vrot.lane.b32.xlu1 %v2376_v5, %s2744_s17 }
 0x5c7   : > { %v2420_v54 = vpop.permute.xlu2 %2419 }
 0x5ff   : > { %v2380_v4 = vpop.permute.xlu1 %2379 }
 0x600   : > { %v2385_v50 = vsel %vm592_vm0, %v2380_v4, 0.0 }
 0x601   : > { %2386 = vadd.xlane.f32.xlu1 %v2385_v50 }
 0x638   : > { %v2382_v12 = vpop.permute.xlu1 %2381 }
 0x639   : > { %v2388_v36 = vsel %vm592_vm0, %v2382_v12, 0.0 }
 0x63a   : > { %2389 = vadd.xlane.f32.xlu0 %v2388_v36 }
 0x64e   : > { %2426 = vrot.lane.b32.xlu0 %v2615_v16, %s2744_s17 }
 0x674   : > { %v2387_v23 = vpop.xlane.xlu1 %2386 }
 0x675   : > { %v2391_v17 = vmul.f32 0.015625, %v2387_v23 }
 0x677   : > { %v2393_v30 = vadd.f32 1e-05, %v2391_v17 }
 0x679   : > { %2728 = vrsqrt.f32 %v2393_v30  ;;  %vm2401_vm2 = vweird.f32 %v2393_v30 }
 0x67f   : > { %v2729_v7 = vpop.eup %2728 }
 0x680   : > { %v2396_v49 = vmul.f32 %v2729_v7, %v2393_v30  ;;  %vm2402_vm1 = vweird.f32 %v2729_v7 }
 0x681   : > { %vm2403_vm3 = vmor %vm2401_vm2, %vm2402_vm1 }
 0x682   : > { %v2397_v22 = vmul.f32 %v2729_v7, %v2396_v49 }
 0x684   : > { %v2398_v61 = vmul.f32 0.5, %v2397_v22 }
 0x686   : > { %v2399_v25 = vsub.f32 1.5, %v2398_v61 }
 0x688   : > { %v2400_v15 = vmul.f32 %v2729_v7, %v2399_v25 }
 0x68a   : > { %v2404_v53 = vsel %vm2403_vm3, %v2729_v7, %v2400_v15 }
 0x68b   : > { %v2415_v44 = vmul.f32 %v2404_v53, %v2373_v13 }
 0x68d   : > { %v2422_v42 = vmul.f32 %v2420_v54, %v2415_v44 }
 0x6ad   : > { %v2390_v40 = vpop.xlane.xlu0 %2389 }
 0x6ae   : > { %v2392_v47 = vmul.f32 0.015625, %v2390_v40 }
 0x6b0   : > { %v2394_v21 = vadd.f32 1e-05, %v2392_v47 }
 0x6b2   : > { %2730 = vrsqrt.f32 %v2394_v21  ;;  %vm2411_vm7 = vweird.f32 %v2394_v21 }
 0x6b8   : > { %v2731_v39 = vpop.eup %2730 }
 0x6b9   : > { %v2406_v45 = vmul.f32 %v2731_v39, %v2394_v21  ;;  %vm2412_vm9 = vweird.f32 %v2731_v39 }
 0x6ba   : > { %vm2413_vm13 = vmor %vm2411_vm7, %vm2412_vm9 }
 0x6bb   : > { %v2407_v2 = vmul.f32 %v2731_v39, %v2406_v45 }
 0x6bd   : > { %v2408_v59 = vmul.f32 0.5, %v2407_v2 }
 0x6bf   : > { %v2409_v43 = vsub.f32 1.5, %v2408_v59 }
 0x6c0   : > { %v2427_v48 = vpop.permute.xlu0 %2426 }
 0x6c1   : > { %v2410_v19 = vmul.f32 %v2731_v39, %v2409_v43  ;;  %v2429_v56 = vadd.f32 %v2427_v48, %v2422_v42 }
 0x6c3   : > { %v2414_v57 = vsel %vm2413_vm13, %v2731_v39, %v2410_v19  ;;  %2732 = vtanh.f32 %v2429_v56 }
 0x6c4   : > { %v2416_v9 = vmul.f32 %v2414_v57, %v2374_v8 }
 0x6c6   : > { %v2423_v11 = vmul.f32 %v2420_v54, %v2416_v9 }
 0x6c8   : > { %v2430_v32 = vadd.f32 %v2427_v48, %v2423_v11 }
 0x6c9   : > { %v2733_v20 = vpop.eup %2732 }
 0x6ca   : > { %2734 = vtanh.f32 %v2430_v32  ;;  %2435 = vrot.lane.b32.xlu1 %v2733_v20, %s2744_s17 }
 0x6d0   : > { %v2735_v14 = vpop.eup %2734 }
 0x6d1   : > { %2437 = vrot.lane.b32.xlu2 %v2735_v14, %s2744_s17 }
 0x72b   : > { %v2438_v63 = vpop.permute.xlu2 %2437 }
 0x72c   : > { %v2442_v27 = vmul.f32 %v2438_v63, %v4481_v37 }
 0x72e   : > { %v2444_v10 = vsel %vm592_vm0, %v2442_v27, %v2430_v32 }
 0x72f   : > { %2446 = vst [vmem:[%s540_s22 + $0x8] sm:$0xff] %v2444_v10 }
 0x73c   : > { %v2436_v1 = vpop.permute.xlu1 %2435 }
 0x73d   : > { %v2441_v24 = vmul.f32 %v2436_v1, %v4474_v26 }
 0x73f   : > { %v2443_v0 = vsel %vm592_vm0, %v2441_v24, %v2429_v56 }
 0x740   : > { %2445 = vst [vmem:[%s540_s22] sm:$0xff] %v2443_v0 }
 0x741 PF: > { %s25_s18 = sadd.s32 1, %s2742_s18  }
 0x742   : > { %p22_p5 = scmp.ge.s32.totalorder %s25_s18, 5  }
 0x744   :  { %24 = sbr.rel (!%p22_p5) target bundleno = 1 (0x1), region = 116 }

</bundles_post_ra>
